<compile_context>
chip_gen: v7x
topology: tpu7x:2x2x1
jax: 0.10.0
libtpu: 0.0.40
codegen_flags: <defaults>
</compile_context>

<pallas_src>
import jax
import jax.numpy as jnp
from jax import lax
from jax.experimental import pallas as pl
from jax.experimental.pallas import tpu as pltpu
import numpy as np

# --- small, module-consistent shapes (scaled down from embed=1024/heads=8/hidden=2048) ---
B = 2            # batch
S = 8            # sequence length
E = 32           # embed_dim
NUM_HEADS = 4
HEAD_DIM = E // NUM_HEADS
HID = 64         # feed-forward hidden dim
LN_EPS = 1e-5

R = B * S              # flattened rows
G = B * NUM_HEADS      # (batch, head) attention groups


def encoder_block_kernel(x_ref,
                         wqkv_ref, bqkv_ref,
                         wo_ref, bo_ref,
                         w1_ref, b1_ref, w2_ref, b2_ref,
                         gamma_ref, beta_ref,
                         out_ref):
    f32 = jnp.float32
    bf16 = jnp.bfloat16

    x = x_ref[...]                      # (R, E) f32 -- residual path stays f32
    x_mm = x.astype(bf16)               # bf16 operand for the MXU

    # ---- fused, folded QKV projection: one lane-dense bf16 matmul, f32 accumulation
    #      (user projections, in_proj bias and the 1/sqrt(Dh) scale pre-folded into wqkv/bqkv)
    qkv = jnp.dot(x_mm, wqkv_ref[...], preferred_element_type=f32) + bqkv_ref[...]   # (R, 3E) f32

    # q | k | v are contiguous E-wide column blocks (128-aligned at real E=1024).
    q = qkv[:, 0:E]
    k = qkv[:, E:2 * E]
    v = qkv[:, 2 * E:3 * E]

    # ---- layout-aware head split: single reshape+transpose, no per-head slicing/concat ----
    qh = q.reshape(B, S, NUM_HEADS, HEAD_DIM).transpose(0, 2, 1, 3).reshape(G, S, HEAD_DIM)
    vh = v.reshape(B, S, NUM_HEADS, HEAD_DIM).transpose(0, 2, 1, 3).reshape(G, S, HEAD_DIM)
    # K produced directly in (G, Dh, S): the scores contraction maps to the MXU
    # without an implicit per-step XLU transpose inside the dot_general.
    kh_t = k.reshape(B, S, NUM_HEADS, HEAD_DIM).transpose(0, 2, 3, 1).reshape(G, HEAD_DIM, S)

    # ---- all heads / batches in one batched contraction (scale already folded into q) ----
    s = jnp.einsum("gqd,gdk->gqk", qh.astype(bf16), kh_t.astype(bf16),
                   preferred_element_type=f32)                          # (G, S, S) f32
    s = s - jnp.max(s, axis=-1, keepdims=True)
    p = jnp.exp(s)
    p = p * pl.reciprocal(jnp.sum(p, axis=-1, keepdims=True), approx=True)
    o = jnp.einsum("gqk,gkd->gqd", p.astype(bf16), vh.astype(bf16),
                   preferred_element_type=f32)                          # (G, S, Dh) f32
    # TODO(synk): at real sequence lengths this section becomes a KV-tiled flash-style
    # loop with an online-softmax accumulator instead of the full (G, S, S) tensor.

    # ---- heads -> lane-dense (R, E) slab via one transpose+reshape, then out_proj ----
    attn = o.reshape(B, NUM_HEADS, S, HEAD_DIM).transpose(0, 2, 1, 3).reshape(R, E)
    attn_out = jnp.dot(attn.astype(bf16), wo_ref[...], preferred_element_type=f32) + bo_ref[...]

    gamma = gamma_ref[...]
    beta = beta_ref[...]

    def layer_norm(z):
        # one-pass variance: E[z^2] - mean^2 (no dependent second reduction over z)
        mu = jnp.mean(z, axis=-1, keepdims=True)
        ms = jnp.mean(z * z, axis=-1, keepdims=True)
        var = ms - mu * mu
        return (z - mu) * lax.rsqrt(var + LN_EPS) * gamma + beta

    # ---- residual 1 + LayerNorm (f32) ----
    ln1 = layer_norm(x + attn_out)

    # ---- feed-forward: Linear -> ReLU -> Linear (bf16 MXU operands, f32 accumulation) ----
    h1 = jnp.maximum(
        jnp.dot(ln1.astype(bf16), w1_ref[...], preferred_element_type=f32) + b1_ref[...], 0.0)
    ff = jnp.dot(h1.astype(bf16), w2_ref[...], preferred_element_type=f32) + b2_ref[...]

    # ---- residual 2 + LayerNorm (same params) -> single unmasked full-tile store ----
    out_ref[...] = layer_norm(ff + ln1)


def _fold_and_fuse_qkv(p):
    """Host-side algebraic weight folding (identical math, done once per call, in f32).

    - user query/key projections are folded into the MHA in_proj weights,
    - the 1/sqrt(head_dim) softmax scale is folded into the q weights/bias,
    - q | k | v stay as three contiguous E-wide column blocks (lane-aligned slices
      in the kernel; 128-aligned at the real E=1024).
    """
    scale = 1.0 / float(HEAD_DIM) ** 0.5
    wq = (p["wq_u"] @ p["wqi"]) * scale
    bq = p["bqi"] * scale
    wk = p["wk_u"] @ p["wki"]
    bk = p["bki"]
    wv = p["wk_u"] @ p["wvi"]      # value path uses key_projection, as in the module
    bv = p["bvi"]
    wqkv = jnp.concatenate([wq, wk, wv], axis=1)   # (E, 3E)
    bqkv = jnp.concatenate([bq, bk, bv], axis=1)   # (1, 3E)
    return wqkv, bqkv


def transformer_encoder_block(x, params):
    """x: (B, S, E) float32. params: dict of pre-transposed (in, out) weights / (1, n) biases."""
    wqkv, bqkv = _fold_and_fuse_qkv(params)
    bf16 = jnp.bfloat16

    # Matmul weights cast to bf16 once in the wrapper (halves weight DMA bytes,
    # doubles MXU throughput); biases / LayerNorm params stay f32.
    weight_args = [wqkv.astype(bf16), bqkv,
                   params["wo"].astype(bf16), params["bo"],
                   params["w1"].astype(bf16), params["b1"],
                   params["w2"].astype(bf16), params["b2"],
                   params["gamma"], params["beta"]]

    # Flatten batch into the sublane dimension in the wrapper (free layout plumbing):
    # all row-wise ops see one (B*S, E) slab and the kernel stores one full tile.
    x2d = x.reshape(R, E)

    full = lambda shp: pl.BlockSpec(shp, lambda i: (0,) * len(shp))
    in_specs = [full(x2d.shape)] + [full(tuple(w.shape)) for w in weight_args]

    # Advisory cost estimate so XLA can overlap surrounding ops with the kernel.
    flops = (2 * R * E * 3 * E                    # fused QKV projection
             + 2 * G * S * S * HEAD_DIM * 2       # scores + p@v
             + 2 * R * E * E                      # out_proj
             + 2 * R * E * HID * 2)               # feed-forward
    bytes_accessed = (4 * int(x2d.size)
                      + sum(int(w.size) * w.dtype.itemsize for w in weight_args)
                      + 4 * R * E)
    cost = pl.CostEstimate(flops=flops, transcendentals=G * S * S,
                           bytes_accessed=bytes_accessed)

    # NOTE: at the real module size (E=1024, HID=2048, long S) this becomes a
    # (row_tiles,) "parallel" grid (uses both TCs on v7x) with bf16 weights resident
    # via constant index_maps + pipeline_mode=pl.Buffered(1), a raised
    # vmem_limit_bytes, and flash-style KV tiling for attention; at this toy size
    # one invocation avoids the ~0.35 us/step pipeline overhead entirely.
    out2d = pl.pallas_call(
        encoder_block_kernel,
        out_shape=jax.ShapeDtypeStruct((R, E), jnp.float32),
        grid_spec=pltpu.PrefetchScalarGridSpec(
            num_scalar_prefetch=0,
            grid=(1,),
            in_specs=in_specs,
            out_specs=full((R, E)),
        ),
        compiler_params=pltpu.CompilerParams(
            dimension_semantics=("arbitrary",)),
        cost_estimate=cost,
    )(x2d, *weight_args)
    return out2d.reshape(B, S, E)


# ---------------- pure-JAX reference (for verification; UNFOLDED params, all f32) ----------------
def reference_block(x, p):
    q0 = x @ p["wq_u"]
    k0 = x @ p["wk_u"]
    v0 = k0
    q = q0 @ p["wqi"] + p["bqi"]
    k = k0 @ p["wki"] + p["bki"]
    v = v0 @ p["wvi"] + p["bvi"]

    def heads(t):  # (B,S,E) -> (B,H,S,Dh)
        return t.reshape(B, S, NUM_HEADS, HEAD_DIM).transpose(0, 2, 1, 3)

    qh, kh, vh = heads(q), heads(k), heads(v)
    s = jnp.einsum("bhqd,bhkd->bhqk", qh, kh) / float(HEAD_DIM) ** 0.5
    pattn = jax.nn.softmax(s, axis=-1)
    a = jnp.einsum("bhqk,bhkd->bhqd", pattn, vh).transpose(0, 2, 1, 3).reshape(B, S, E)
    attn_out = a @ p["wo"] + p["bo"]

    def ln(z):
        mu = jnp.mean(z, -1, keepdims=True)
        var = jnp.mean((z - mu) ** 2, -1, keepdims=True)
        return (z - mu) * lax.rsqrt(var + LN_EPS) * p["gamma"] + p["beta"]

    ln1 = ln(x + attn_out)
    ff = jnp.maximum(ln1 @ p["w1"] + p["b1"], 0.0) @ p["w2"] + p["b2"]
    return ln(ff + ln1)


def make_params(key):
    ks = jax.random.split(key, 16)
    sc = 0.05
    p = {
        # user q/k projections, pre-transposed to (in, out)
        "wq_u": jax.random.normal(ks[0], (E, E), jnp.float32) * sc,
        "wk_u": jax.random.normal(ks[1], (E, E), jnp.float32) * sc,
        # nn.MultiheadAttention in_proj (split) + biases
        "wqi": jax.random.normal(ks[2], (E, E), jnp.float32) * sc,
        "wki": jax.random.normal(ks[3], (E, E), jnp.float32) * sc,
        "wvi": jax.random.normal(ks[4], (E, E), jnp.float32) * sc,
        "bqi": jax.random.normal(ks[5], (1, E), jnp.float32) * sc,
        "bki": jax.random.normal(ks[6], (1, E), jnp.float32) * sc,
        "bvi": jax.random.normal(ks[7], (1, E), jnp.float32) * sc,
        # out_proj
        "wo": jax.random.normal(ks[8], (E, E), jnp.float32) * sc,
        "bo": jax.random.normal(ks[9], (1, E), jnp.float32) * sc,
        # feed-forward
        "w1": jax.random.normal(ks[10], (E, HID), jnp.float32) * sc,
        "b1": jax.random.normal(ks[11], (1, HID), jnp.float32) * sc,
        "w2": jax.random.normal(ks[12], (HID, E), jnp.float32) * sc,
        "b2": jax.random.normal(ks[13], (1, E), jnp.float32) * sc,
        # shared LayerNorm (the module reuses one LayerNorm for both residuals)
        "gamma": jnp.ones((1, E), jnp.float32),
        "beta": jnp.zeros((1, E), jnp.float32),
    }
    return p


if __name__ == "__main__":
    key = jax.random.PRNGKey(0)
    kx, kp = jax.random.split(key)
    x = jax.random.normal(kx, (B, S, E), jnp.float32)
    params = make_params(kp)

    out = transformer_encoder_block(x, params)
    out = jax.block_until_ready(out)

    ref = reference_block(x, params)
    # tolerance accounts for bf16 MXU operands (f32 accumulation) and the EUP
    # approximate reciprocal in the softmax denominator; semantics are unchanged.
    np.testing.assert_allclose(np.asarray(out), np.asarray(ref), rtol=2e-2, atol=2e-2)

    print("KERNEL_OK")
</pallas_src>

<mosaic_0001>
module attributes {stable_mosaic.version = 11 : i64} {
  func.func @encoder_block_kernel(%arg0: i32, %arg1: memref<16x32xf32, #tpu.memory_space<vmem>>, %arg2: memref<32x96xbf16, #tpu.memory_space<vmem>>, %arg3: memref<1x96xf32, #tpu.memory_space<vmem>>, %arg4: memref<32x32xbf16, #tpu.memory_space<vmem>>, %arg5: memref<1x32xf32, #tpu.memory_space<vmem>>, %arg6: memref<32x64xbf16, #tpu.memory_space<vmem>>, %arg7: memref<1x64xf32, #tpu.memory_space<vmem>>, %arg8: memref<64x32xbf16, #tpu.memory_space<vmem>>, %arg9: memref<1x32xf32, #tpu.memory_space<vmem>>, %arg10: memref<1x32xf32, #tpu.memory_space<vmem>>, %arg11: memref<1x32xf32, #tpu.memory_space<vmem>>, %arg12: memref<16x32xf32, #tpu.memory_space<vmem>>) attributes {dimension_semantics = [#tpu.dimension_semantics<arbitrary>], iteration_bounds = array<i64: 1>, scalar_prefetch = 0 : i64, scratch_operands = 0 : i64, tpu.core_type = #tpu.core_type<tc>, window_params = [{pipeline_mode = #tpu.pipeline_mode<synchronous>, transform_indices = @transform_0, window_bounds = array<i64: 16, 32>}, {pipeline_mode = #tpu.pipeline_mode<synchronous>, transform_indices = @transform_1, window_bounds = array<i64: 32, 96>}, {pipeline_mode = #tpu.pipeline_mode<synchronous>, transform_indices = @transform_2, window_bounds = array<i64: 1, 96>}, {pipeline_mode = #tpu.pipeline_mode<synchronous>, transform_indices = @transform_3, window_bounds = array<i64: 32, 32>}, {pipeline_mode = #tpu.pipeline_mode<synchronous>, transform_indices = @transform_4, window_bounds = array<i64: 1, 32>}, {pipeline_mode = #tpu.pipeline_mode<synchronous>, transform_indices = @transform_5, window_bounds = array<i64: 32, 64>}, {pipeline_mode = #tpu.pipeline_mode<synchronous>, transform_indices = @transform_6, window_bounds = array<i64: 1, 64>}, {pipeline_mode = #tpu.pipeline_mode<synchronous>, transform_indices = @transform_7, window_bounds = array<i64: 64, 32>}, {pipeline_mode = #tpu.pipeline_mode<synchronous>, transform_indices = @transform_8, window_bounds = array<i64: 1, 32>}, {pipeline_mode = #tpu.pipeline_mode<synchronous>, transform_indices = @transform_9, window_bounds = array<i64: 1, 32>}, {pipeline_mode = #tpu.pipeline_mode<synchronous>, transform_indices = @transform_10, window_bounds = array<i64: 1, 32>}, {pipeline_mode = #tpu.pipeline_mode<synchronous>, transform_indices = @transform_11, window_bounds = array<i64: 16, 32>}]} {
    %c0 = arith.constant 0 : index
    %c0_0 = arith.constant 0 : index
    %0 = vector.load %arg1[%c0, %c0_0] : memref<16x32xf32, #tpu.memory_space<vmem>>, vector<16x32xf32>
    %1 = arith.truncf %0 : vector<16x32xf32> to vector<16x32xbf16>
    %c0_1 = arith.constant 0 : index
    %c0_2 = arith.constant 0 : index
    %2 = vector.load %arg2[%c0_1, %c0_2] : memref<32x96xbf16, #tpu.memory_space<vmem>>, vector<32x96xbf16>
    %cst = arith.constant dense<0.000000e+00> : vector<16x96xf32>
    %3 = tpu.matmul %1, %2, %cst {dimension_numbers = #tpu.dot_dimension_numbers<[1], [0], [0], [1], [0, 0, 1, 1], [], []>} : vector<16x32xbf16>, vector<32x96xbf16>, vector<16x96xf32> -> vector<16x96xf32>
    %c0_3 = arith.constant 0 : index
    %c0_4 = arith.constant 0 : index
    %4 = vector.load %arg3[%c0_3, %c0_4] : memref<1x96xf32, #tpu.memory_space<vmem>>, vector<1x96xf32>
    %5 = vector.broadcast %4 : vector<1x96xf32> to vector<16x96xf32>
    %6 = arith.addf %3, %5 : vector<16x96xf32>
    %7 = vector.extract_strided_slice %6 {offsets = [0, 0], sizes = [16, 32], strides = [1, 1]} : vector<16x96xf32> to vector<16x32xf32>
    %8 = vector.extract_strided_slice %6 {offsets = [0, 32], sizes = [16, 32], strides = [1, 1]} : vector<16x96xf32> to vector<16x32xf32>
    %9 = vector.extract_strided_slice %6 {offsets = [0, 64], sizes = [16, 32], strides = [1, 1]} : vector<16x96xf32> to vector<16x32xf32>
    %10 = vector.shape_cast %7 : vector<16x32xf32> to vector<2x8x4x8xf32>
    %11 = tpu.transpose %10, [0, 2, 1, 3] : vector<2x8x4x8xf32> -> vector<2x4x8x8xf32>
    %12 = vector.shape_cast %11 : vector<2x4x8x8xf32> to vector<8x8x8xf32>
    %13 = vector.shape_cast %9 : vector<16x32xf32> to vector<2x8x4x8xf32>
    %14 = tpu.transpose %13, [0, 2, 1, 3] : vector<2x8x4x8xf32> -> vector<2x4x8x8xf32>
    %15 = vector.shape_cast %14 : vector<2x4x8x8xf32> to vector<8x8x8xf32>
    %16 = vector.shape_cast %8 : vector<16x32xf32> to vector<2x8x4x8xf32>
    %17 = tpu.transpose %16, [0, 2, 3, 1] : vector<2x8x4x8xf32> -> vector<2x4x8x8xf32>
    %18 = vector.shape_cast %17 : vector<2x4x8x8xf32> to vector<8x8x8xf32>
    %19 = arith.truncf %12 : vector<8x8x8xf32> to vector<8x8x8xbf16>
    %20 = arith.truncf %18 : vector<8x8x8xf32> to vector<8x8x8xbf16>
    "tpu.trace_start"() <{level = 10 : i32, message = "gqd,gdk->gqk"}> : () -> ()
    %cst_5 = arith.constant dense<0.000000e+00> : vector<8x8x8xf32>
    %21 = tpu.matmul %19, %20, %cst_5 {dimension_numbers = #tpu.dot_dimension_numbers<[2], [1], [1], [2], [0, 0, 0, 1, 1, 2], [0], [0]>} : vector<8x8x8xbf16>, vector<8x8x8xbf16>, vector<8x8x8xf32> -> vector<8x8x8xf32>
    "tpu.trace_stop"() : () -> ()
    %cst_6 = arith.constant dense<0xFF800000> : vector<8x8xf32>
    %22 = vector.multi_reduction <maximumf>, %21, %cst_6 [2] : vector<8x8x8xf32> to vector<8x8xf32>
    %23 = vector.shape_cast %22 : vector<8x8xf32> to vector<8x8x1xf32>
    %24 = vector.broadcast %23 : vector<8x8x1xf32> to vector<8x8x8xf32>
    %25 = arith.subf %21, %24 : vector<8x8x8xf32>
    %26 = math.exp %25 : vector<8x8x8xf32>
    %cst_7 = arith.constant dense<0.000000e+00> : vector<8x8xf32>
    %27 = vector.multi_reduction <add>, %26, %cst_7 [2] : vector<8x8x8xf32> to vector<8x8xf32>
    %28 = vector.shape_cast %27 : vector<8x8xf32> to vector<8x8x1xf32>
    %29 = tpu.reciprocal %28 {approx = true} : vector<8x8x1xf32> -> vector<8x8x1xf32>
    %30 = vector.broadcast %29 : vector<8x8x1xf32> to vector<8x8x8xf32>
    %31 = arith.mulf %26, %30 : vector<8x8x8xf32>
    %32 = arith.truncf %31 : vector<8x8x8xf32> to vector<8x8x8xbf16>
    %33 = arith.truncf %15 : vector<8x8x8xf32> to vector<8x8x8xbf16>
    "tpu.trace_start"() <{level = 10 : i32, message = "gqk,gkd->gqd"}> : () -> ()
    %cst_8 = arith.constant dense<0.000000e+00> : vector<8x8x8xf32>
    %34 = tpu.matmul %32, %33, %cst_8 {dimension_numbers = #tpu.dot_dimension_numbers<[2], [1], [1], [2], [0, 0, 0, 1, 1, 2], [0], [0]>} : vector<8x8x8xbf16>, vector<8x8x8xbf16>, vector<8x8x8xf32> -> vector<8x8x8xf32>
    "tpu.trace_stop"() : () -> ()
    %35 = vector.shape_cast %34 : vector<8x8x8xf32> to vector<2x4x8x8xf32>
    %36 = tpu.transpose %35, [0, 2, 1, 3] : vector<2x4x8x8xf32> -> vector<2x8x4x8xf32>
    %37 = vector.shape_cast %36 : vector<2x8x4x8xf32> to vector<16x32xf32>
    %38 = arith.truncf %37 : vector<16x32xf32> to vector<16x32xbf16>
    %c0_9 = arith.constant 0 : index
    %c0_10 = arith.constant 0 : index
    %39 = vector.load %arg4[%c0_9, %c0_10] : memref<32x32xbf16, #tpu.memory_space<vmem>>, vector<32x32xbf16>
    %cst_11 = arith.constant dense<0.000000e+00> : vector<16x32xf32>
    %40 = tpu.matmul %38, %39, %cst_11 {dimension_numbers = #tpu.dot_dimension_numbers<[1], [0], [0], [1], [0, 0, 1, 1], [], []>} : vector<16x32xbf16>, vector<32x32xbf16>, vector<16x32xf32> -> vector<16x32xf32>
    %c0_12 = arith.constant 0 : index
    %c0_13 = arith.constant 0 : index
    %41 = vector.load %arg5[%c0_12, %c0_13] : memref<1x32xf32, #tpu.memory_space<vmem>>, vector<1x32xf32>
    %42 = vector.broadcast %41 : vector<1x32xf32> to vector<16x32xf32>
    %43 = arith.addf %40, %42 : vector<16x32xf32>
    %c0_14 = arith.constant 0 : index
    %c0_15 = arith.constant 0 : index
    %44 = vector.load %arg10[%c0_14, %c0_15] : memref<1x32xf32, #tpu.memory_space<vmem>>, vector<1x32xf32>
    %c0_16 = arith.constant 0 : index
    %c0_17 = arith.constant 0 : index
    %45 = vector.load %arg11[%c0_16, %c0_17] : memref<1x32xf32, #tpu.memory_space<vmem>>, vector<1x32xf32>
    %46 = arith.addf %0, %43 : vector<16x32xf32>
    %cst_18 = arith.constant dense<0.000000e+00> : vector<16xf32>
    %47 = vector.multi_reduction <add>, %46, %cst_18 [1] : vector<16x32xf32> to vector<16xf32>
    %48 = vector.shape_cast %47 : vector<16xf32> to vector<16x1xf32>
    %cst_19 = arith.constant 3.200000e+01 : f32
    %49 = vector.broadcast %cst_19 : f32 to vector<16x1xf32>
    %50 = arith.divf %48, %49 : vector<16x1xf32>
    %51 = arith.mulf %46, %46 : vector<16x32xf32>
    %cst_20 = arith.constant dense<0.000000e+00> : vector<16xf32>
    %52 = vector.multi_reduction <add>, %51, %cst_20 [1] : vector<16x32xf32> to vector<16xf32>
    %53 = vector.shape_cast %52 : vector<16xf32> to vector<16x1xf32>
    %cst_21 = arith.constant 3.200000e+01 : f32
    %54 = vector.broadcast %cst_21 : f32 to vector<16x1xf32>
    %55 = arith.divf %53, %54 : vector<16x1xf32>
    %56 = arith.mulf %50, %50 : vector<16x1xf32>
    %57 = arith.subf %55, %56 : vector<16x1xf32>
    %58 = vector.broadcast %50 : vector<16x1xf32> to vector<16x32xf32>
    %59 = arith.subf %46, %58 : vector<16x32xf32>
    %cst_22 = arith.constant 9.99999974E-6 : f32
    %60 = vector.broadcast %cst_22 : f32 to vector<16x1xf32>
    %61 = arith.addf %57, %60 : vector<16x1xf32>
    %62 = math.rsqrt %61 : vector<16x1xf32>
    %63 = vector.broadcast %62 : vector<16x1xf32> to vector<16x32xf32>
    %64 = arith.mulf %59, %63 : vector<16x32xf32>
    %65 = vector.broadcast %44 : vector<1x32xf32> to vector<16x32xf32>
    %66 = arith.mulf %64, %65 : vector<16x32xf32>
    %67 = vector.broadcast %45 : vector<1x32xf32> to vector<16x32xf32>
    %68 = arith.addf %66, %67 : vector<16x32xf32>
    %69 = arith.truncf %68 : vector<16x32xf32> to vector<16x32xbf16>
    %c0_23 = arith.constant 0 : index
    %c0_24 = arith.constant 0 : index
    %70 = vector.load %arg6[%c0_23, %c0_24] : memref<32x64xbf16, #tpu.memory_space<vmem>>, vector<32x64xbf16>
    %cst_25 = arith.constant dense<0.000000e+00> : vector<16x64xf32>
    %71 = tpu.matmul %69, %70, %cst_25 {dimension_numbers = #tpu.dot_dimension_numbers<[1], [0], [0], [1], [0, 0, 1, 1], [], []>} : vector<16x32xbf16>, vector<32x64xbf16>, vector<16x64xf32> -> vector<16x64xf32>
    %c0_26 = arith.constant 0 : index
    %c0_27 = arith.constant 0 : index
    %72 = vector.load %arg7[%c0_26, %c0_27] : memref<1x64xf32, #tpu.memory_space<vmem>>, vector<1x64xf32>
    %73 = vector.broadcast %72 : vector<1x64xf32> to vector<16x64xf32>
    %74 = arith.addf %71, %73 : vector<16x64xf32>
    %cst_28 = arith.constant 0.000000e+00 : f32
    %75 = vector.broadcast %cst_28 : f32 to vector<16x64xf32>
    %76 = arith.maximumf %74, %75 : vector<16x64xf32>
    %77 = arith.truncf %76 : vector<16x64xf32> to vector<16x64xbf16>
    %c0_29 = arith.constant 0 : index
    %c0_30 = arith.constant 0 : index
    %78 = vector.load %arg8[%c0_29, %c0_30] : memref<64x32xbf16, #tpu.memory_space<vmem>>, vector<64x32xbf16>
    %cst_31 = arith.constant dense<0.000000e+00> : vector<16x32xf32>
    %79 = tpu.matmul %77, %78, %cst_31 {dimension_numbers = #tpu.dot_dimension_numbers<[1], [0], [0], [1], [0, 0, 1, 1], [], []>} : vector<16x64xbf16>, vector<64x32xbf16>, vector<16x32xf32> -> vector<16x32xf32>
    %c0_32 = arith.constant 0 : index
    %c0_33 = arith.constant 0 : index
    %80 = vector.load %arg9[%c0_32, %c0_33] : memref<1x32xf32, #tpu.memory_space<vmem>>, vector<1x32xf32>
    %81 = vector.broadcast %80 : vector<1x32xf32> to vector<16x32xf32>
    %82 = arith.addf %79, %81 : vector<16x32xf32>
    %83 = arith.addf %82, %68 : vector<16x32xf32>
    %cst_34 = arith.constant dense<0.000000e+00> : vector<16xf32>
    %84 = vector.multi_reduction <add>, %83, %cst_34 [1] : vector<16x32xf32> to vector<16xf32>
    %85 = vector.shape_cast %84 : vector<16xf32> to vector<16x1xf32>
    %cst_35 = arith.constant 3.200000e+01 : f32
    %86 = vector.broadcast %cst_35 : f32 to vector<16x1xf32>
    %87 = arith.divf %85, %86 : vector<16x1xf32>
    %88 = arith.mulf %83, %83 : vector<16x32xf32>
    %cst_36 = arith.constant dense<0.000000e+00> : vector<16xf32>
    %89 = vector.multi_reduction <add>, %88, %cst_36 [1] : vector<16x32xf32> to vector<16xf32>
    %90 = vector.shape_cast %89 : vector<16xf32> to vector<16x1xf32>
    %cst_37 = arith.constant 3.200000e+01 : f32
    %91 = vector.broadcast %cst_37 : f32 to vector<16x1xf32>
    %92 = arith.divf %90, %91 : vector<16x1xf32>
    %93 = arith.mulf %87, %87 : vector<16x1xf32>
    %94 = arith.subf %92, %93 : vector<16x1xf32>
    %95 = vector.broadcast %87 : vector<16x1xf32> to vector<16x32xf32>
    %96 = arith.subf %83, %95 : vector<16x32xf32>
    %cst_38 = arith.constant 9.99999974E-6 : f32
    %97 = vector.broadcast %cst_38 : f32 to vector<16x1xf32>
    %98 = arith.addf %94, %97 : vector<16x1xf32>
    %99 = math.rsqrt %98 : vector<16x1xf32>
    %100 = vector.broadcast %99 : vector<16x1xf32> to vector<16x32xf32>
    %101 = arith.mulf %96, %100 : vector<16x32xf32>
    %102 = vector.broadcast %44 : vector<1x32xf32> to vector<16x32xf32>
    %103 = arith.mulf %101, %102 : vector<16x32xf32>
    %104 = vector.broadcast %45 : vector<1x32xf32> to vector<16x32xf32>
    %105 = arith.addf %103, %104 : vector<16x32xf32>
    %c0_39 = arith.constant 0 : index
    %c0_40 = arith.constant 0 : index
    %106 = vector.load %arg12[%c0_39, %c0_40] : memref<16x32xf32, #tpu.memory_space<vmem>>, vector<16x32xf32>
    tpu.vector_store %arg12[%c0_39, %c0_40], %105 {strides = array<i32>} : memref<16x32xf32, #tpu.memory_space<vmem>>, vector<16x32xf32>,
    return
  }
  func.func @transform_0(%arg0: i32) -> (i32, i32) {
    %c0_i32 = arith.constant 0 : i32
    %c0_i32_0 = arith.constant 0 : i32
    %c0_i32_1 = arith.constant 0 : i32
    return %c0_i32, %c0_i32_0 : i32, i32
  }
  func.func @transform_1(%arg0: i32) -> (i32, i32) {
    %c0_i32 = arith.constant 0 : i32
    %c0_i32_0 = arith.constant 0 : i32
    %c0_i32_1 = arith.constant 0 : i32
    return %c0_i32, %c0_i32_0 : i32, i32
  }
  func.func @transform_2(%arg0: i32) -> (i32, i32) {
    %c0_i32 = arith.constant 0 : i32
    %c0_i32_0 = arith.constant 0 : i32
    %c0_i32_1 = arith.constant 0 : i32
    return %c0_i32, %c0_i32_0 : i32, i32
  }
  func.func @transform_3(%arg0: i32) -> (i32, i32) {
    %c0_i32 = arith.constant 0 : i32
    %c0_i32_0 = arith.constant 0 : i32
    %c0_i32_1 = arith.constant 0 : i32
    return %c0_i32, %c0_i32_0 : i32, i32
  }
  func.func @transform_4(%arg0: i32) -> (i32, i32) {
    %c0_i32 = arith.constant 0 : i32
    %c0_i32_0 = arith.constant 0 : i32
    %c0_i32_1 = arith.constant 0 : i32
    return %c0_i32, %c0_i32_0 : i32, i32
  }
  func.func @transform_5(%arg0: i32) -> (i32, i32) {
    %c0_i32 = arith.constant 0 : i32
    %c0_i32_0 = arith.constant 0 : i32
    %c0_i32_1 = arith.constant 0 : i32
    return %c0_i32, %c0_i32_0 : i32, i32
  }
  func.func @transform_6(%arg0: i32) -> (i32, i32) {
    %c0_i32 = arith.constant 0 : i32
    %c0_i32_0 = arith.constant 0 : i32
    %c0_i32_1 = arith.constant 0 : i32
    return %c0_i32, %c0_i32_0 : i32, i32
  }
  func.func @transform_7(%arg0: i32) -> (i32, i32) {
    %c0_i32 = arith.constant 0 : i32
    %c0_i32_0 = arith.constant 0 : i32
    %c0_i32_1 = arith.constant 0 : i32
    return %c0_i32, %c0_i32_0 : i32, i32
  }
  func.func @transform_8(%arg0: i32) -> (i32, i32) {
    %c0_i32 = arith.constant 0 : i32
    %c0_i32_0 = arith.constant 0 : i32
    %c0_i32_1 = arith.constant 0 : i32
    return %c0_i32, %c0_i32_0 : i32, i32
  }
  func.func @transform_9(%arg0: i32) -> (i32, i32) {
    %c0_i32 = arith.constant 0 : i32
    %c0_i32_0 = arith.constant 0 : i32
    %c0_i32_1 = arith.constant 0 : i32
    return %c0_i32, %c0_i32_0 : i32, i32
  }
  func.func @transform_10(%arg0: i32) -> (i32, i32) {
    %c0_i32 = arith.constant 0 : i32
    %c0_i32_0 = arith.constant 0 : i32
    %c0_i32_1 = arith.constant 0 : i32
    return %c0_i32, %c0_i32_0 : i32, i32
  }
  func.func @transform_11(%arg0: i32) -> (i32, i32) {
    %c0_i32 = arith.constant 0 : i32
    %c0_i32_0 = arith.constant 0 : i32
    %c0_i32_1 = arith.constant 0 : i32
    return %c0_i32, %c0_i32_0 : i32, i32
  }
}

</mosaic_0001>

<bundles_post_ra>
// kernel: tpu_custom_call.1
= control target key start
LH: loop header
LB: loop body
LE: loop exit
PB: predicated region body
PF: predicated region fallthrough
CT: control target
= control target key end

     0   :  { %16 = vsyncpa [#allocation3], 0  ;;  %s4780_s0 = inlined_call_operand.vmem [shape: f32[16,32], index: 0, kind: input, shape index: {}]   ;;  %s4781_s1 = inlined_call_operand.vmem [shape: bf16[32,96], index: 1, kind: input, shape index: {}]   ;;  %s4782_s2 = inlined_call_operand.vmem [shape: f32[1,96], index: 2, kind: input, shape index: {}]   ;;  %s4783_s3 = inlined_call_operand.vmem [shape: bf16[32,32], index: 3, kind: input, shape index: {}]   ;;  %s4784_s4 = inlined_call_operand.vmem [shape: f32[1,32], index: 4, kind: input, shape index: {}]   ;;  %s4785_s5 = inlined_call_operand.hbm [shape: bf16[32,64], index: 5, kind: input, shape index: {}]   ;;  %s4786_s6 = inlined_call_operand.vmem [shape: f32[1,64], index: 6, kind: input, shape index: {}]   ;;  %s4787_s7 = inlined_call_operand.vmem [shape: bf16[64,32], index: 7, kind: input, shape index: {}]   ;;  %s4788_s8 = inlined_call_operand.vmem [shape: f32[1,32], index: 8, kind: input, shape index: {}]   ;;  %s4789_s9 = inlined_call_operand.vmem [shape: f32[1,32], index: 9, kind: input, shape index: {}]   ;;  %s4790_s10 = inlined_call_operand.vmem [shape: f32[1,32], index: 10, kind: input, shape index: {}]   ;;  %s4791_s11 = inlined_call_operand.hbm [shape: f32[16,32], index: 11, kind: output, shape index: {}]  }
   0x1   :  { %17 = vsyncpa [#allocation4], 0  ;;  %s4153_s17 = smov [#allocation2]   ;;  %s4105_s21 = scalar_lea.hbm %s4785_s5, 256 }
   0x2   :  { %s33_s18 = sshll.u32 %s4153_s17, 4  ;;  %p4106_p0 = scmp.ne.s32.totalorder %s4785_s5, %s4105_s21  ;;  %s34_s18 = int_to_ptr.vmem [resolvable:$true] %s33_s18 }
   0x3   :  { %p4109_p1 = scmp.lt.u32.totalorder %s4105_s21, %s4785_s5 }
   0x5   :  { %p4111_p2 = pnand %p4109_p1, %p4106_p0 }
   0x7   :  { %4114 = shalt.err (!%p4111_p2)
}
   0x8   :  { %s4115_s26 = scalar_lea.vmem %s34_s18, 256  ;;  %p4120_p4 = scmp.lt.s32.totalorder %s34_s18, %s34_s18 }
   0x9   :  { %p4116_p3 = scmp.ne.s32.totalorder %s34_s18, %s4115_s26  ;;  %p4121_p5 = scmp.lt.s32.totalorder %s4115_s26, %s4115_s26 }
   0xb   :  { %p4122_p6 = por %p4121_p5, %p4120_p4 }
   0xd   :  { %p4123_p7 = pnand %p4122_p6, %p4116_p3 }
   0xf   :  { %4126 = shalt.err (!%p4123_p7)
}
  0x10   :  { %s4154_s27 = smov 64   ;;  %s4155_s28 = smov 4  }
  0x11   :  { %39 = dma.hbm_to_vmem [thread:$0]  %s4785_s5, 256, %s34_s18, [#allocation3], %s4154_s27, %s4154_s27, %s4155_s28  }
  0x12   :  { %4149 = dma.done.wait [#allocation3], 256  }
  0x13   :  { %4150 = vsyncadd [#allocation3], 4294967040  ;;  %v4156_v0 = vmov 0.0   ;;  %vm4157_vm0 = vmmov 0   ;;  %v4053_v1 = vld [vmem:[%s4781_s1] sm:$0xff]   ;;  %v4054_v2 = vld [vmem:[%s4781_s1 + $0x8] sm:$0xff]   ;;  %v150_v21 = vlaneseq }
  0x14   :  { %3890 = vmatprep.subr.bf16.mxu0 %v4156_v0  ;;  %3894 = vmatprep.mubr.msk.bf16.mxu0 %vm4157_vm0, %v4156_v0  ;;  %v54_v3 = vld [vmem:[%s4780_s0] sm:$0xff]  ;;  %v55_v4 = vld [vmem:[%s4780_s0 + $0x8] sm:$0xff]  ;;  %vm80_vm1 = vcmask 261120   ;;  %s4158_s20 = smov 104   ;;  %s4159_s21 = smov 120   ;;  %vm2325_vm2 = vcmask 1043456  }
  0x15   :  { %3898 = vmatprep.subr.bf16.mxu1 %v4156_v0  ;;  %3900 = vmatprep.mubr.msk.bf16.mxu1 %vm4157_vm0, %v4156_v0  ;;  %v56_v5 = vpack.c.bf16 %v55_v4, %v54_v3  ;;  %v3796_v6 = vld [vmem:[%s4782_s2] ss:$0 sm:$0xff]  ;;  %s4160_s22 = smov 112   ;;  %s4161_s2 = smov 96   ;;  %v4162_v19 = vmov 1983009808  }
  0x16   :  { %3891 = vmatpush3.bf16.msra.mxu0 %v4053_v1  ;;  %v148_v20 = vunpack.c.l.s4 %v4162_v19  ;;  %v151_v23 = vshrl.u32 %v150_v21, 7  ;;  %v4163_v24 = vmov 1934713408   ;;  %vm2321_vm3 = vcmask 64512   ;;  %s4165_s28 = smov 8   ;;  %s4166_s29 = smov 24  }
  0x17   :  { %3892 = vmatprep.subr.bf16.mxu0 %v4156_v0  ;;  %v180_v25 = vunpack.c.l.s4 %v4163_v24  ;;  %vm3461_vm4 = vcmask 130048   ;;  %vm3464_vm5 = vcmask 195584   ;;  %vm3696_vm6 = vcmask 523264  }
  0x18   :  { %v149_v22 = vunpack.c.0.s8 %v148_v20 }
  0x19   :  { %v181_v29 = vunpack.c.0.s8 %v180_v25 }
  0x1a   :  { %3893 = vmatpush3.bf16.msra.mxu0 %v4054_v2  ;;  %v4299_v28 = vsub.s32 %v149_v22, %v151_v23 }
  0x1b   :  { %3922 = vmatprep.subr.bf16.mxu0 %v4156_v0  ;;  %v4305_v41 = vsub.s32 %v181_v29, %v151_v23 }
  0x1d   :  { %3895 = vmatmul.mubr.msk.bf16.vlgmr.msra.gmra.mrb[0].mxu0 %vm80_vm1, %v56_v5 }
  0x1e   :  { %3924 = vmatprep.mubr.msk.bf16.mxu0 %vm4157_vm0, %v4156_v0 }
  0xf0   :  { %v118_v7 = vpop.f32.mrb[0].mxu0 }
  0xf1   :  { %v4269_v8 = vadd.f32 %v3796_v6, %v118_v7  ;;  %v3896_v9 = vpop.f32.mrb[1].mxu0 }
  0xf2   :  { %v121_v10 = vpop.f32.mrb[2].mxu0 }
  0xf3   :  { %139 = vrot.lane.b32.xlu1 %v4269_v8, %s4158_s20  ;;  %127 = vrot.lane.b32.xlu0 %v4269_v8, %s4159_s21  ;;  %v3897_v11 = vpop.f32.mrb[3].mxu0  ;;  %v4273_v12 = vadd.f32 %v3796_v6, %v121_v10 }
  0xf7   :  { %133 = vrot.lane.b32.xlu0 %v4269_v8, %s4160_s22  ;;  %129 = vrot.lane.b32.xlu1 %v4273_v12, %s4159_s21 }
  0xfb   :  { %135 = vrot.lane.b32.xlu0 %v4273_v12, %s4160_s22  ;;  %141 = vrot.lane.b32.xlu1 %v4273_v12, %s4158_s20 }
  0xff   :  { %713 = vrot.lane.b32.xlu0 %v4269_v8, %s4161_s2 }
 0x165   :  { %v4280_v13 = vpop.permute.xlu0 %127  ;;  %v4282_v14 = vpop.permute.xlu1 %139 }
 0x166   :  { %717 = vrot.lane.b32.xlu1 %v4280_v13, %s4161_s2 }
 0x169   :  { %v4285_v15 = vpop.permute.xlu0 %133  ;;  %v4289_v16 = vpop.permute.xlu1 %129 }
 0x16a   :  { %721 = vrot.lane.b32.xlu0 %v4285_v15, %s4161_s2  ;;  %725 = vrot.lane.b32.xlu1 %v4282_v14, %s4161_s2 }
 0x16d   :  { %v4293_v17 = vpop.permute.xlu0 %135  ;;  %v4295_v18 = vpop.permute.xlu1 %141 }
 0x16e   :  { %715 = vrot.lane.b32.xlu0 %v4273_v12, %s4161_s2  ;;  %719 = vrot.lane.b32.xlu1 %v4289_v16, %s4161_s2 }
 0x171   :  { %v714_v26 = vpop.permute.xlu0 %713 }
 0x172   :  { %723 = vrot.lane.b32.xlu0 %v4293_v17, %s4161_s2  ;;  %727 = vrot.lane.b32.xlu1 %v4295_v18, %s4161_s2 }
 0x1d8   :  { %v718_v27 = vpop.permute.xlu1 %717 }
 0x1dc   :  { %v722_v30 = vpop.permute.xlu0 %721  ;;  %v726_v31 = vpop.permute.xlu1 %725 }
 0x1dd   :  { %v737_v32 = vcombine.low %v714_v26, %v722_v30  ;;  %v738_v33 = vcombine.high %v714_v26, %v722_v30  ;;  %v753_v34 = vcombine.low %v718_v27, %v726_v31  ;;  %v754_v35 = vcombine.high %v718_v27, %v726_v31 }
 0x1df   :  { %v745_v36 = vrot.slane %v737_v32, %v4299_v28  ;;  %v752_v37 = vrot.slane %v738_v33, %v4299_v28  ;;  %v761_v38 = vrot.slane %v753_v34, %v4299_v28  ;;  %v768_v39 = vrot.slane %v754_v35, %v4299_v28 }
 0x1e0   :  { %v716_v40 = vpop.permute.xlu0 %715  ;;  %v720_v42 = vpop.permute.xlu1 %719 }
 0x1e1   :  { %v769_v43 = vcombine.low %v745_v36, %v761_v38  ;;  %v785_v44 = vcombine.low %v752_v37, %v768_v39  ;;  %v770_v46 = vcombine.high %v745_v36, %v761_v38  ;;  %v786_v48 = vcombine.high %v752_v37, %v768_v39 }
 0x1e3   :  { %v777_v45 = vrot.slane %v769_v43, %v4305_v41  ;;  %v793_v52 = vrot.slane %v785_v44, %v4305_v41  ;;  %v784_v55 = vrot.slane %v770_v46, %v4305_v41  ;;  %v800_v57 = vrot.slane %v786_v48, %v4305_v41 }
 0x1e4   :  { %v724_v47 = vpop.permute.xlu0 %723  ;;  %v728_v50 = vpop.permute.xlu1 %727 }
 0x1e5   :  { %v805_v49 = vcombine.low %v716_v40, %v724_v47  ;;  %873 = vxpose.xlu0.b32.start.end [1/1] (short) (narrow) %v777_v45, 8  ;;  %v801_v51 = vcombine.high %v777_v45, %v4156_v0  ;;  %v821_v53 = vcombine.low %v720_v42, %v728_v50  ;;  %v806_v58 = vcombine.high %v716_v40, %v724_v47 }
 0x1e6   :  { %v822_v59 = vcombine.high %v720_v42, %v728_v50  ;;  %v803_v60 = vcombine.high %v793_v52, %v4156_v0  ;;  %v804_v62 = vcombine.high %v800_v57, %v4156_v0  ;;  %v802_v4 = vcombine.high %v784_v55, %v4156_v0 }
 0x1e7   :  { %v813_v54 = vrot.slane %v805_v49, %v4299_v28  ;;  %905 = vxpose.xlu1.b32.start.end [1/1] (short) (narrow) %v801_v51, 8  ;;  %v829_v56 = vrot.slane %v821_v53, %v4299_v28  ;;  %v820_v63 = vrot.slane %v806_v58, %v4299_v28 }
 0x1e8   :  { %v836_v1 = vrot.slane %v822_v59, %v4299_v28 }
 0x1e9   :  { %937 = vxpose.xlu0.b32.start.end [1/1] (short) (narrow) %v784_v55, 8  ;;  %v837_v61 = vcombine.low %v813_v54, %v829_v56  ;;  %v838_v3 = vcombine.high %v813_v54, %v829_v56 }
 0x1ea   :  { %v853_v7 = vcombine.low %v820_v63, %v836_v1  ;;  %v854_v11 = vcombine.high %v820_v63, %v836_v1 }
 0x1eb   :  { %1033 = vxpose.xlu1.b32.start.end [1/1] (short) (narrow) %v803_v60, 8  ;;  %v845_v2 = vrot.slane %v837_v61, %v4305_v41  ;;  %v852_v6 = vrot.slane %v838_v3, %v4305_v41 }
 0x1ec   :  { %v861_v10 = vrot.slane %v853_v7, %v4305_v41  ;;  %v868_v20 = vrot.slane %v854_v11, %v4305_v41 }
 0x1ed   :  { %1001 = vxpose.xlu0.b32.start.end [1/1] (short) (narrow) %v793_v52, 8  ;;  %v869_v5 = vcombine.high %v845_v2, %v4156_v0  ;;  %v870_v9 = vcombine.high %v852_v6, %v4156_v0 }
 0x1ee   :  { %v871_v19 = vcombine.high %v861_v10, %v4156_v0  ;;  %v872_v21 = vcombine.high %v868_v20, %v4156_v0 }
 0x1ef   :  { %1097 = vxpose.xlu1.b32.start.end [1/1] (short) (narrow) %v804_v62, 8 }
 0x1f1   :  { %969 = vxpose.xlu0.b32.start.end [1/1] (short) (narrow) %v802_v4, 8 }
 0x1f3   :  { %1161 = vxpose.xlu1.b32.start.end [1/1] (short) (narrow) %v869_v5, 8 }
 0x1f5   :  { %1065 = vxpose.xlu0.b32.start.end [1/1] (short) (narrow) %v800_v57, 8 }
 0x1f7   :  { %1225 = vxpose.xlu1.b32.start.end [1/1] (short) (narrow) %v870_v9, 8 }
 0x1f9   :  { %1129 = vxpose.xlu0.b32.start.end [1/1] (short) (narrow) %v845_v2, 8 }
 0x1fb   :  { %1289 = vxpose.xlu1.b32.start.end [1/1] (short) (narrow) %v871_v19, 8 }
 0x1fd   :  { %1193 = vxpose.xlu0.b32.start.end [1/1] (short) (narrow) %v852_v6, 8 }
 0x1ff   :  { %1353 = vxpose.xlu1.b32.start.end [1/1] (short) (narrow) %v872_v21, 8 }
 0x201   :  { %1257 = vxpose.xlu0.b32.start.end [1/1] (short) (narrow) %v861_v10, 8 }
 0x205   :  { %1321 = vxpose.xlu0.b32.start.end [1/1] (short) (narrow) %v868_v20, 8 }
 0x265   :  { %v889_v22 = vpop.trf.xlu0 }
 0x267   :  { %v921_v23 = vpop.trf.xlu1 }
 0x269   :  { %v953_v24 = vpop.trf.xlu0 }
 0x26a   :  { %v1385_v30 = vcombine.low %v889_v22, %v953_v24  ;;  %v1386_v46 = vcombine.high %v889_v22, %v953_v24 }
 0x26b   :  { %v1049_v25 = vpop.trf.xlu1 }
 0x26c   :  { %v1393_v36 = vrot.slane %v1385_v30, %v4299_v28  ;;  %v1400_v57 = vrot.slane %v1386_v46, %v4299_v28 }
 0x26d   :  { %v1017_v26 = vpop.trf.xlu0 }
 0x26f   :  { %v1113_v27 = vpop.trf.xlu1 }
 0x270   :  { %v1433_v34 = vcombine.low %v1049_v25, %v1113_v27  ;;  %v1434_v39 = vcombine.high %v1049_v25, %v1113_v27 }
 0x271   :  { %v985_v29 = vpop.trf.xlu0 }
 0x272   :  { %v1401_v31 = vcombine.low %v921_v23, %v985_v29  ;;  %v1402_v42 = vcombine.high %v921_v23, %v985_v29  ;;  %v1441_v43 = vrot.slane %v1433_v34, %v4299_v28  ;;  %v1448_v51 = vrot.slane %v1434_v39, %v4299_v28 }
 0x273   :  { %v4327_v32 = vpop.trf.xlu1 }
 0x274   :  { %v1409_v33 = vrot.slane %v1401_v31, %v4299_v28  ;;  %v1416_v53 = vrot.slane %v1402_v42, %v4299_v28 }
 0x275   :  { %v1081_v35 = vpop.trf.xlu0 }
 0x276   :  { %v1417_v37 = vcombine.low %v1017_v26, %v1081_v35  ;;  %v1418_v38 = vcombine.high %v1017_v26, %v1081_v35  ;;  %v1449_v45 = vcombine.low %v1393_v36, %v1409_v33  ;;  %v1450_v56 = vcombine.high %v1393_v36, %v1409_v33 }
 0x277   :  { %v4331_v40 = vpop.trf.xlu1  ;;  %v1465_v2 = vcombine.low %v1400_v57, %v1416_v53  ;;  %v1466_v11 = vcombine.high %v1400_v57, %v1416_v53 }
 0x278   :  { %v1425_v44 = vrot.slane %v1417_v37, %v4299_v28  ;;  %v1432_v48 = vrot.slane %v1418_v38, %v4299_v28  ;;  %v1457_v54 = vrot.slane %v1449_v45, %v4305_v41  ;;  %v1464_v1 = vrot.slane %v1450_v56, %v4305_v41 }
 0x279   :  { %v1145_v47 = vpop.trf.xlu0  ;;  %v1537_v3 = vcombine.low %v4327_v32, %v4331_v40  ;;  %v1473_v21 = vrot.slane %v1465_v2, %v4305_v41  ;;  %v1480_v33 = vrot.slane %v1466_v11, %v4305_v41  ;;  %v1538_v37 = vcombine.high %v4327_v32, %v4331_v40 }
 0x27a   :  { %v1481_v49 = vcombine.low %v1425_v44, %v1441_v43  ;;  %v1482_v50 = vcombine.high %v1425_v44, %v1441_v43  ;;  %v1497_v62 = vcombine.low %v1432_v48, %v1448_v51  ;;  %v1498_v6 = vcombine.high %v1432_v48, %v1448_v51 }
 0x27b   :  { %v1305_v52 = vpop.trf.xlu1  ;;  %v1545_v22 = vrot.slane %v1537_v3, %v4299_v28 }
 0x27c   :  { %v1489_v55 = vrot.slane %v1481_v49, %v4305_v41  ;;  %v1496_v61 = vrot.slane %v1482_v50, %v4305_v41  ;;  %v1505_v10 = vrot.slane %v1497_v62, %v4305_v41  ;;  %v1512_v24 = vrot.slane %v1498_v6, %v4305_v41 }
 0x27d   :  { %v1209_v58 = vpop.trf.xlu0  ;;  %v1552_v50 = vrot.slane %v1538_v37, %v4299_v28  ;;  %v161_v6 = vcombine.low %v4280_v13, %v4282_v14 }
 0x27e   :  { %v1514_v59 = vcombine.high %v1457_v54, %v1489_v55  ;;  %v1513_v60 = vcombine.low %v1457_v54, %v1489_v55  ;;  %v1521_v63 = vcombine.low %v1145_v47, %v1209_v58  ;;  %v1516_v7 = vcombine.high %v1464_v1, %v1496_v61 }
 0x27f   :  { %v1369_v5 = vpop.trf.xlu1  ;;  %v1515_v9 = vcombine.low %v1464_v1, %v1496_v61  ;;  %v1518_v27 = vcombine.high %v1473_v21, %v1505_v10  ;;  %v1517_v29 = vcombine.low %v1473_v21, %v1505_v10  ;;  %v1522_v30 = vcombine.high %v1145_v47, %v1209_v58 }
 0x280   :  { %1689 = vxpose.xlu1.b32.start.end [1/1] (short) (narrow) %v1514_v59, 8  ;;  %1657 = vxpose.xlu0.b32.start.end [1/1] (short) (narrow) %v1513_v60, 8  ;;  %v1529_v19 = vrot.slane %v1521_v63, %v4299_v28  ;;  %v1569_v20 = vcombine.low %v1305_v52, %v1369_v5  ;;  %v1570_v31 = vcombine.high %v1305_v52, %v1369_v5 }
 0x281   :  { %v1273_v4 = vpop.trf.xlu0  ;;  %v1520_v38 = vcombine.high %v1480_v33, %v1512_v24  ;;  %v1519_v42 = vcombine.low %v1480_v33, %v1512_v24  ;;  %v1536_v45 = vrot.slane %v1522_v30, %v4299_v28  ;;  %v146_v5 = vcombine.high %v4269_v8, %v4285_v15 }
 0x282   :  { %v1577_v34 = vrot.slane %v1569_v20, %v4299_v28  ;;  %v1585_v36 = vcombine.low %v1529_v19, %v1545_v22  ;;  %v1586_v46 = vcombine.high %v1529_v19, %v1545_v22  ;;  %v1584_v47 = vrot.slane %v1570_v31, %v4299_v28 }
 0x283   :  { %v1601_v54 = vcombine.low %v1536_v45, %v1552_v50  ;;  %v1602_v60 = vcombine.high %v1536_v45, %v1552_v50  ;;  %v160_v10 = vrot.slane %v146_v5, %v4299_v28  ;;  %v169_v11 = vrot.slane %v161_v6, %v4299_v28 }
 0x284   :  { %1753 = vxpose.xlu1.b32.start.end [1/1] (short) (narrow) %v1516_v7, 8  ;;  %1721 = vxpose.xlu0.b32.start.end [1/1] (short) (narrow) %v1515_v9, 8  ;;  %v1593_v48 = vrot.slane %v1585_v36, %v4305_v41  ;;  %v1600_v53 = vrot.slane %v1586_v46, %v4305_v41  ;;  %v162_v7 = vcombine.high %v4280_v13, %v4282_v14 }
 0x285   :  { %v1337_v23 = vpop.trf.xlu0  ;;  %v1609_v59 = vrot.slane %v1601_v54, %v4305_v41  ;;  %v1616_v1 = vrot.slane %v1602_v60, %v4305_v41  ;;  %v213_v30 = vcombine.low %v4273_v12, %v4293_v17  ;;  %v229_v31 = vcombine.low %v4289_v16, %v4295_v18 }
 0x286   :  { %v1553_v25 = vcombine.low %v1273_v4, %v1337_v23  ;;  %v1554_v26 = vcombine.high %v1273_v4, %v1337_v23  ;;  %v145_v4 = vcombine.low %v4269_v8, %v4285_v15  ;;  %v176_v19 = vrot.slane %v162_v7, %v4299_v28 }
 0x287   :  { %v230_v36 = vcombine.high %v4289_v16, %v4295_v18  ;;  %v221_v45 = vrot.slane %v213_v30, %v4299_v28  ;;  %v237_v46 = vrot.slane %v229_v31, %v4299_v28 }
 0x288   :  { %v1561_v35 = vrot.slane %v1553_v25, %v4299_v28  ;;  %1817 = vxpose.xlu1.b32.start.end [1/1] (short) (narrow) %v1518_v27, 8  ;;  %1785 = vxpose.xlu0.b32.start.end [1/1] (short) (narrow) %v1517_v29, 8  ;;  %v1568_v39 = vrot.slane %v1554_v26, %v4299_v28  ;;  %v153_v9 = vrot.slane %v145_v4, %v4299_v28 }
 0x289   :  { %v193_v22 = vcombine.low %v160_v10, %v176_v19  ;;  %v194_v23 = vcombine.high %v160_v10, %v176_v19  ;;  %v244_v50 = vrot.slane %v230_v36, %v4299_v28 }
 0x28a   :  { %v1617_v43 = vcombine.low %v1561_v35, %v1577_v34  ;;  %v1618_v44 = vcombine.high %v1561_v35, %v1577_v34  ;;  %v1633_v52 = vcombine.low %v1568_v39, %v1584_v47  ;;  %v1634_v58 = vcombine.high %v1568_v39, %v1584_v47 }
 0x28b   :  { %v177_v20 = vcombine.low %v153_v9, %v169_v11  ;;  %v178_v21 = vcombine.high %v153_v9, %v169_v11  ;;  %v201_v27 = vrot.slane %v193_v22, %v4305_v41  ;;  %v208_v29 = vrot.slane %v194_v23, %v4305_v41 }
 0x28c   :  { %1881 = vxpose.xlu1.b32.start.end [1/1] (short) (narrow) %v1520_v38, 8  ;;  %1849 = vxpose.xlu0.b32.start.end [1/1] (short) (narrow) %v1519_v42, 8  ;;  %v1625_v49 = vrot.slane %v1617_v43, %v4305_v41  ;;  %v1632_v51 = vrot.slane %v1618_v44, %v4305_v41  ;;  %v1641_v57 = vrot.slane %v1633_v52, %v4305_v41 }
 0x28d   :  { %v1648_v63 = vrot.slane %v1634_v58, %v4305_v41  ;;  %v185_v25 = vrot.slane %v177_v20, %v4305_v41  ;;  %v192_v26 = vrot.slane %v178_v21, %v4305_v41  ;;  %v214_v35 = vcombine.high %v4273_v12, %v4293_v17 }
 0x28e   :  { %v1650_v32 = vcombine.high %v1593_v48, %v1625_v49  ;;  %v1649_v40 = vcombine.low %v1593_v48, %v1625_v49  ;;  %v1652_v55 = vcombine.high %v1600_v53, %v1632_v51  ;;  %v1651_v56 = vcombine.low %v1600_v53, %v1632_v51 }
 0x28f   :  { %v1654_v61 = vcombine.high %v1609_v59, %v1641_v57  ;;  %v1653_v62 = vcombine.low %v1609_v59, %v1641_v57  ;;  %v1656_v2 = vcombine.high %v1616_v1, %v1648_v63  ;;  %v1655_v3 = vcombine.low %v1616_v1, %v1648_v63 }
 0x290   :  { %1945 = vxpose.xlu1.b32.start.end [1/1] (short) (narrow) %v1650_v32, 8  ;;  %1913 = vxpose.xlu0.b32.start.end [1/1] (short) (narrow) %v1649_v40, 8  ;;  %v281_v37 = vcombine.low %v185_v25, %v192_v26  ;;  %v3800_v38 = vcombine.high %v185_v25, %v192_v26  ;;  %v297_v39 = vcombine.low %v201_v27, %v208_v29 }
 0x291   :  { %v3801_v42 = vcombine.high %v201_v27, %v208_v29  ;;  %v228_v49 = vrot.slane %v214_v35, %v4299_v28 }
 0x292   :  { %v4398_v32 = vrot.slane %v281_v37, %v4299_v28  ;;  %v4401_v40 = vrot.slane %v3800_v38, %v4299_v28  ;;  %v4404_v51 = vrot.slane %v297_v39, %v4299_v28 }
 0x293   :  { %v4407_v52 = vrot.slane %v3801_v42, %v4299_v28 }
 0x294   :  { %2009 = vxpose.xlu1.b32.start.end [1/1] (short) (narrow) %v1652_v55, 8  ;;  %1977 = vxpose.xlu0.b32.start.end [1/1] (short) (narrow) %v1651_v56, 8  ;;  %v245_v55 = vcombine.low %v221_v45, %v237_v46  ;;  %v246_v56 = vcombine.high %v221_v45, %v237_v46  ;;  %v313_v63 = vcombine.low %v4398_v32, %v4401_v40 }
 0x295   :  { %v329_v1 = vcombine.low %v4404_v51, %v4407_v52 }
 0x296   :  { %v253_v5 = vrot.slane %v245_v55, %v4305_v41  ;;  %v260_v6 = vrot.slane %v246_v56, %v4305_v41  ;;  %v321_v20 = vrot.slane %v313_v63, %v4305_v41 }
 0x297   :  { %v337_v21 = vrot.slane %v329_v1, %v4305_v41 }
 0x298   :  { %2073 = vxpose.xlu1.b32.start.end [1/1] (short) (narrow) %v1654_v61, 8  ;;  %2041 = vxpose.xlu0.b32.start.end [1/1] (short) (narrow) %v1653_v62, 8  ;;  %v261_v61 = vcombine.low %v228_v49, %v244_v50  ;;  %v262_v62 = vcombine.high %v228_v49, %v244_v50  ;;  %v3802_v26 = vcombine.high %v253_v5, %v260_v6 }
 0x299   :  { %v346_v1 = vcombine.high %v321_v20, %v337_v21 }
 0x29a   :  { %v269_v11 = vrot.slane %v261_v61, %v4305_v41  ;;  %v276_v19 = vrot.slane %v262_v62, %v4305_v41 }
 0x29c   :  { %2137 = vxpose.xlu1.b32.start.end [1/1] (short) (narrow) %v1656_v2, 8  ;;  %2105 = vxpose.xlu0.b32.start.end [1/1] (short) (narrow) %v1655_v3, 8  ;;  %v365_v31 = vcombine.low %v269_v11, %v276_v19 }
 0x2ba   :  { %417 = vrot.lane.b32.xlu1 %v4269_v8, %s4154_s27 }
 0x300   :  { %v1673_v24 = vpop.trf.xlu0  ;;  %v1705_v8 = vpop.trf.xlu1 }
 0x304   :  { %v1737_v33 = vpop.trf.xlu0  ;;  %v1769_v34 = vpop.trf.xlu1 }
 0x305   :  { %v2169_v43 = vcombine.low %v1673_v24, %v1737_v33  ;;  %v2177_v44 = vcombine.low %v1705_v8, %v1769_v34  ;;  %v349_v24 = vcombine.low %v253_v5, %v260_v6  ;;  %v3803_v33 = vcombine.high %v269_v11, %v276_v19 }
 0x306   :  { %v345_v34 = vcombine.low %v321_v20, %v337_v21 }
 0x307   :  { %v2176_v53 = vrot.slane %v2169_v43, %v4299_v28  ;;  %v2184_v54 = vrot.slane %v2177_v44, %v4299_v28  ;;  %v4426_v43 = vrot.slane %v349_v24, %v4299_v28  ;;  %v380_v49 = vrot.slane %v3803_v33, %v4299_v28 }
 0x308   :  { %v1801_v47 = vpop.trf.xlu0  ;;  %v1833_v48 = vpop.trf.xlu1  ;;  %v2305_v55 = vpack.c.bf16 %v345_v34, %v345_v34 }
 0x309   :  { %v2201_v2 = vcombine.low %v2176_v53, %v2184_v54  ;;  %v2202_v35 = vcombine.high %v2176_v53, %v2184_v54 }
 0x30b   :  { %v2209_v22 = vrot.slane %v2201_v2, %v4305_v41  ;;  %v2216_v50 = vrot.slane %v2202_v35, %v4305_v41 }
 0x30c   :  { %v1865_v57 = vpop.trf.xlu0  ;;  %v1897_v58 = vpop.trf.xlu1 }
 0x30d   :  { %v2185_v59 = vcombine.low %v1801_v47, %v1865_v57  ;;  %v2193_v60 = vcombine.low %v1833_v48, %v1897_v58  ;;  %v364_v47 = vrot.slane %v3802_v26, %v4299_v28  ;;  %v372_v48 = vrot.slane %v365_v31, %v4299_v28 }
 0x30e   :  { %v314_v58 = vcombine.high %v4398_v32, %v4401_v40 }
 0x30f   :  { %v2192_v3 = vrot.slane %v2185_v59, %v4299_v28  ;;  %v2200_v4 = vrot.slane %v2193_v60, %v4299_v28  ;;  %v330_v59 = vcombine.high %v4404_v51, %v4407_v52  ;;  %v381_v2 = vcombine.low %v4426_v43, %v364_v47 }
 0x310   :  { %v1929_v7 = vpop.trf.xlu0  ;;  %v1961_v9 = vpop.trf.xlu1  ;;  %v382_v31 = vcombine.high %v4426_v43, %v364_v47  ;;  %v398_v33 = vcombine.high %v372_v48, %v380_v49 }
 0x311   :  { %v2217_v10 = vcombine.low %v2192_v3, %v2200_v4  ;;  %v2218_v27 = vcombine.high %v2192_v3, %v2200_v4  ;;  %v397_v3 = vcombine.low %v372_v48, %v380_v49  ;;  %v389_v11 = vrot.slane %v381_v2, %v4305_v41 }
 0x313   :  { %v2225_v23 = vrot.slane %v2217_v10, %v4305_v41  ;;  %v2232_v44 = vrot.slane %v2218_v27, %v4305_v41  ;;  %v344_v10 = vrot.slane %v330_v59, %v4305_v41  ;;  %v405_v19 = vrot.slane %v397_v3, %v4305_v41 }
 0x314   :  { %v1993_v8 = vpop.trf.xlu0  ;;  %v2025_v25 = vpop.trf.xlu1 }
 0x315   :  { %v2233_v29 = vcombine.low %v2209_v22, %v2225_v23  ;;  %v2234_v30 = vcombine.high %v2209_v22, %v2225_v23  ;;  %v2237_v36 = vcombine.low %v1929_v7, %v1993_v8  ;;  %v2245_v37 = vcombine.low %v1961_v9, %v2025_v25 }
 0x316   :  { %v2235_v63 = vcombine.low %v2216_v50, %v2232_v44  ;;  %v328_v7 = vrot.slane %v314_v58, %v4305_v41  ;;  %v2306_v9 = vpack.c.bf16 %v346_v1, %v346_v1  ;;  %v2236_v25 = vcombine.high %v2216_v50, %v2232_v44 }
 0x317   :  { %v2313_v38 = vpack.c.bf16 %v2233_v29, %v2233_v29  ;;  %v2314_v46 = vpack.c.bf16 %v2234_v30, %v2234_v30  ;;  %v2244_v53 = vrot.slane %v2237_v36, %v4299_v28  ;;  %v2252_v54 = vrot.slane %v2245_v37, %v4299_v28 }
 0x318   :  { %v2057_v39 = vpop.trf.xlu0  ;;  %v2089_v42 = vpop.trf.xlu1  ;;  %v2315_v6 = vpack.c.bf16 %v2235_v63, %v2235_v63  ;;  %v347_v27 = vcombine.low %v328_v7, %v344_v10  ;;  %v413_v30 = vcombine.low %v389_v11, %v405_v19  ;;  %v2316_v35 = vpack.c.bf16 %v2236_v25, %v2236_v25 }
 0x319   :  { %v2327_v45 = vsel %vm2325_vm2, %v2313_v38, 0  ;;  %v2373_v62 = vsel %vm2325_vm2, %v2314_v46, 0  ;;  %v2269_v4 = vcombine.low %v2244_v53, %v2252_v54  ;;  %v2270_v32 = vcombine.high %v2244_v53, %v2252_v54 }
 0x31a   :  { %3899 = vmatpush3.bf16.msra.mxu1 %v2327_v45  ;;  %v2419_v24 = vsel %vm2325_vm2, %v2315_v6, 0  ;;  %v2307_v37 = vpack.c.bf16 %v347_v27, %v347_v27  ;;  %v2309_v38 = vpack.c.bf16 %v413_v30, %v413_v30  ;;  %v2465_v44 = vsel %vm2325_vm2, %v2316_v35, 0 }
 0x31b   :  { %3904 = vmatprep.subr.bf16.mxu1 %v4156_v0  ;;  %v2277_v20 = vrot.slane %v2269_v4, %v4305_v41  ;;  %v2284_v21 = vrot.slane %v2270_v32, %v4305_v41  ;;  %v348_v46 = vcombine.high %v328_v7, %v344_v10 }
 0x31c   :  { %v2121_v56 = vpop.trf.xlu0  ;;  %v2153_v57 = vpop.trf.xlu1 }
 0x31d   :  { %v2253_v60 = vcombine.low %v2057_v39, %v2121_v56  ;;  %v2261_v61 = vcombine.low %v2089_v42, %v2153_v57  ;;  %3901 = vmatmul.mubr.msk.bf16.vlgmr.msra.gmra.mrb[0].mxu1 %vm2321_vm3, %v2305_v55  ;;  %v396_v39 = vrot.slane %v382_v31, %v4305_v41  ;;  %v412_v42 = vrot.slane %v398_v33, %v4305_v41 }
 0x31e   :  { %3905 = vmatpush3.bf16.msra.mxu1 %v2373_v62  ;;  %3906 = vmatprep.mubr.msk.bf16.mxu1 %vm4157_vm0, %v4156_v0  ;;  %v2308_v49 = vpack.c.bf16 %v348_v46, %v348_v46  ;;  %v414_v55 = vcombine.high %v389_v11, %v405_v19 }
 0x31f   :  { %v2260_v40 = vrot.slane %v2253_v60, %v4299_v28  ;;  %v2268_v51 = vrot.slane %v2261_v61, %v4299_v28  ;;  %3910 = vmatprep.subr.bf16.mxu1 %v4156_v0  ;;  %v415_v47 = vcombine.low %v396_v39, %v412_v42  ;;  %v416_v59 = vcombine.high %v396_v39, %v412_v42 }
 0x320   :  { %v2310_v57 = vpack.c.bf16 %v414_v55, %v414_v55 }
 0x321   :  { %v2285_v52 = vcombine.low %v2260_v40, %v2268_v51  ;;  %v2286_v5 = vcombine.high %v2260_v40, %v2268_v51  ;;  %v2311_v50 = vpack.c.bf16 %v415_v47, %v415_v47  ;;  %v2312_v60 = vpack.c.bf16 %v416_v59, %v416_v59 }
 0x323   :  { %v2293_v22 = vrot.slane %v2285_v52, %v4305_v41  ;;  %v2300_v23 = vrot.slane %v2286_v5, %v4305_v41 }
 0x325   :  { %3907 = vmatmul.mubr.msk.bf16.vlgmr.msra.gmra.mrb[4].mxu1 %vm2321_vm3, %v2306_v9  ;;  %v2301_v8 = vcombine.low %v2277_v20, %v2293_v22  ;;  %v2303_v26 = vcombine.low %v2284_v21, %v2300_v23  ;;  %v2302_v45 = vcombine.high %v2277_v20, %v2293_v22  ;;  %v2304_v54 = vcombine.high %v2284_v21, %v2300_v23 }
 0x326   :  { %3911 = vmatpush3.bf16.msra.mxu1 %v2419_v24  ;;  %3912 = vmatprep.mubr.msk.bf16.mxu1 %vm4157_vm0, %v4156_v0 }
 0x327   :  { %v2317_v29 = vpack.c.bf16 %v2301_v8, %v2301_v8  ;;  %3916 = vmatprep.subr.bf16.mxu1 %v4156_v0  ;;  %v2319_v36 = vpack.c.bf16 %v2303_v26, %v2303_v26  ;;  %v2318_v48 = vpack.c.bf16 %v2302_v45, %v2302_v45  ;;  %v2320_v56 = vpack.c.bf16 %v2304_v54, %v2304_v54 }
 0x329   :  { %v2511_v34 = vsel %vm2325_vm2, %v2317_v29, 0  ;;  %v2603_v43 = vsel %vm2325_vm2, %v2319_v36, 0  ;;  %v2557_v53 = vsel %vm2325_vm2, %v2318_v48, 0  ;;  %v2649_v58 = vsel %vm2325_vm2, %v2320_v56, 0 }
 0x32a   :  { %3923 = vmatpush3.bf16.msra.mxu0 %v2511_v34 }
 0x32b   :  { %3934 = vmatprep.subr.bf16.mxu0 %v4156_v0 }
 0x32c   :  { %v418_v48 = vpop.permute.xlu1 %417 }
 0x32d   :  { %3913 = vmatmul.mubr.msk.bf16.vlgmr.msra.gmra.mrb[8].mxu1 %vm2321_vm3, %v2307_v37  ;;  %3925 = vmatmul.mubr.msk.bf16.vlgmr.msra.gmra.mrb[4].mxu0 %vm2321_vm3, %v2309_v38 }
 0x32e   :  { %3917 = vmatpush3.bf16.msra.mxu1 %v2465_v44  ;;  %3935 = vmatpush3.bf16.msra.mxu0 %v2603_v43 }
 0x32f   :  { %3918 = vmatprep.mubr.msk.bf16.mxu1 %vm4157_vm0, %v4156_v0  ;;  %3928 = vmatprep.subr.bf16.mxu1 %v4156_v0 }
 0x330   :  { %3936 = vmatprep.mubr.msk.bf16.mxu0 %vm4157_vm0, %v4156_v0  ;;  %3946 = vmatprep.subr.bf16.mxu0 %v4156_v0 }
 0x335   :  { %3919 = vmatmul.mubr.msk.bf16.vlgmr.msra.gmra.mrb[12].mxu1 %vm2321_vm3, %v2308_v49  ;;  %3937 = vmatmul.mubr.msk.bf16.vlgmr.msra.gmra.mrb[8].mxu0 %vm2321_vm3, %v2311_v50 }
 0x336   :  { %3929 = vmatpush3.bf16.msra.mxu1 %v2557_v53  ;;  %3930 = vmatprep.mubr.msk.bf16.mxu1 %vm4157_vm0, %v4156_v0 }
 0x337   :  { %3940 = vmatprep.subr.bf16.mxu1 %v4156_v0  ;;  %3948 = vmatprep.mubr.msk.bf16.mxu0 %vm4157_vm0, %v4156_v0 }
 0x33d   :  { %3931 = vmatmul.mubr.msk.bf16.vlgmr.msra.gmra.mrb[16].mxu1 %vm2321_vm3, %v2310_v57 }
 0x33e   :  { %3941 = vmatpush3.bf16.msra.mxu1 %v2649_v58  ;;  %3942 = vmatprep.mubr.msk.bf16.mxu1 %vm4157_vm0, %v4156_v0 }
 0x33f   :  { %3952 = vmatprep.subr.bf16.mxu1 %v4156_v0 }
 0x345   :  { %3943 = vmatmul.mubr.msk.bf16.vlgmr.msra.gmra.mrb[20].mxu1 %vm2321_vm3, %v2312_v60 }
 0x346   :  { %3954 = vmatprep.mubr.msk.bf16.mxu1 %vm4157_vm0, %v4156_v0 }
 0x3f0   :  { %v2363_v61 = vpop.f32.mrb[0].mxu1 }
 0x3f1   :  { %v3902_v62 = vpop.f32.mrb[1].mxu1  ;;  %v2691_v63 = vsel %vm2321_vm3, %v2363_v61, -inf }
 0x3f2   :  { %2692 = vmax.xlane.f32.xlu0 %v2691_v63  ;;  %v2366_v1 = vpop.f32.mrb[2].mxu1 }
 0x3f3   :  { %v3903_v2 = vpop.f32.mrb[3].mxu1 }
 0x3f8   :  { %v2409_v3 = vpop.f32.mrb[4].mxu1 }
 0x3f9   :  { %v3908_v4 = vpop.f32.mrb[5].mxu1  ;;  %v2694_v20 = vsel %vm2321_vm3, %v2409_v3, -inf }
 0x3fa   :  { %v2412_v32 = vpop.f32.mrb[6].mxu1 }
 0x3fb   :  { %v3909_v40 = vpop.f32.mrb[7].mxu1 }
 0x400   :  { %v4494_v51 = vpop.f32.mrb[8].mxu1  ;;  %v2547_v52 = vpop.f32.mrb[4].mxu0 }
 0x401   :  { %v3914_v5 = vpop.f32.mrb[9].mxu1  ;;  %v3926_v6 = vpop.f32.mrb[5].mxu0  ;;  %v2703_v7 = vsel %vm2321_vm3, %v2547_v52, -inf  ;;  %v2697_v31 = vsel %vm2321_vm3, %v4494_v51, -inf }
 0x402   :  { %v2458_v9 = vpop.f32.mrb[10].mxu1  ;;  %2704 = vmax.xlane.f32.xlu1 %v2703_v7  ;;  %v2550_v10 = vpop.f32.mrb[6].mxu0 }
 0x403   :  { %v3915_v11 = vpop.f32.mrb[11].mxu1  ;;  %v3927_v19 = vpop.f32.mrb[7].mxu0 }
 0x406   :  { %2695 = vmax.xlane.f32.xlu1 %v2694_v20 }
 0x408   :  { %v2501_v21 = vpop.f32.mrb[12].mxu1  ;;  %v4498_v22 = vpop.f32.mrb[8].mxu0 }
 0x409   :  { %v3920_v23 = vpop.f32.mrb[13].mxu1  ;;  %v3938_v24 = vpop.f32.mrb[9].mxu0  ;;  %v2700_v8 = vsel %vm2321_vm3, %v2501_v21, -inf  ;;  %v2709_v25 = vsel %vm2321_vm3, %v4498_v22, -inf }
 0x40a   :  { %2701 = vmax.xlane.f32.xlu0 %v2700_v8  ;;  %v2504_v26 = vpop.f32.mrb[14].mxu1  ;;  %2710 = vmax.xlane.f32.xlu1 %v2709_v25  ;;  %v2642_v27 = vpop.f32.mrb[10].mxu0 }
 0x40b   :  { %v3921_v29 = vpop.f32.mrb[15].mxu1  ;;  %v3939_v30 = vpop.f32.mrb[11].mxu0 }
 0x40e   :  { %2698 = vmax.xlane.f32.xlu1 %v2697_v31 }
 0x410   :  { %v2593_v33 = vpop.f32.mrb[16].mxu1 }
 0x411   :  { %v3932_v34 = vpop.f32.mrb[17].mxu1  ;;  %v2706_v35 = vsel %vm2321_vm3, %v2593_v33, -inf }
 0x412   :  { %2707 = vmax.xlane.f32.xlu0 %v2706_v35  ;;  %v2596_v36 = vpop.f32.mrb[18].mxu1 }
 0x413   :  { %v3933_v37 = vpop.f32.mrb[19].mxu1 }
 0x418   :  { %v4506_v38 = vpop.f32.mrb[20].mxu1 }
 0x419   :  { %v3944_v39 = vpop.f32.mrb[21].mxu1  ;;  %v2712_v42 = vsel %vm2321_vm3, %v4506_v38, -inf }
 0x41a   :  { %2713 = vmax.xlane.f32.xlu0 %v2712_v42  ;;  %v2688_v44 = vpop.f32.mrb[22].mxu1 }
 0x41b   :  { %v3945_v43 = vpop.f32.mrb[23].mxu1 }
 0x41f   :  { %425 = vrot.lane.b32.xlu1 %v4285_v15, %s4154_s27 }
 0x423   :  { %429 = vrot.lane.b32.xlu1 %v4282_v14, %s4154_s27 }
 0x427   :  { %419 = vrot.lane.b32.xlu1 %v4273_v12, %s4154_s27 }
 0x430   :  { %421 = vrot.lane.b32.xlu0 %v4280_v13, %s4154_s27 }
 0x47f   :  { %v2693_v45 = vpop.xlane.xlu0 %2692 }
 0x480   :  { %v2715_v46 = vsub.f32 %v2363_v61, %v2693_v45 }
 0x482   :  { %v2723_v47 = vmul.f32 1.442695, %v2715_v46 }
 0x484   :  { %4063 = vpow2.f32 %v2723_v47 }
 0x48e   :  { %v4518_v49 = vpop.eup %4063 }
 0x48f   :  { %v2705_v50 = vpop.xlane.xlu1 %2704  ;;  %v2739_v15 = vsel %vm2321_vm3, %v4518_v49, 0.0 }
 0x490   :  { %v2719_v53 = vsub.f32 %v2547_v52, %v2705_v50  ;;  %2740 = vadd.xlane.f32.xlu1 %v2739_v15 }
 0x492   :  { %v2731_v14 = vmul.f32 1.442695, %v2719_v53 }
 0x493   :  { %v2696_v54 = vpop.xlane.xlu1 %2695 }
 0x494   :  { %4065 = vpow2.f32 %v2731_v14  ;;  %v2716_v12 = vsub.f32 %v2409_v3, %v2696_v54 }
 0x496   :  { %v2725_v55 = vmul.f32 1.442695, %v2716_v12 }
 0x497   :  { %v2702_v56 = vpop.xlane.xlu0 %2701  ;;  %v4522_v13 = vpop.xlane.xlu1 %2710 }
 0x498   :  { %4067 = vpow2.f32 %v2725_v55  ;;  %v2718_v57 = vsub.f32 %v2501_v21, %v2702_v56 }
 0x49a   :  { %v2729_v58 = vmul.f32 1.442695, %v2718_v57 }
 0x49b   :  { %v2699_v59 = vpop.xlane.xlu1 %2698 }
 0x49c   :  { %4069 = vpow2.f32 %v2729_v58  ;;  %v2717_v60 = vsub.f32 %v4494_v51, %v2699_v59 }
 0x49e   :  { %v4525_v61 = vpop.eup %4065  ;;  %v2727_v62 = vmul.f32 1.442695, %v2717_v60 }
 0x49f   :  { %v2708_v63 = vpop.xlane.xlu0 %2707  ;;  %v2751_v1 = vsel %vm2321_vm3, %v4525_v61, 0.0  ;;  %v426_v40 = vpop.permute.xlu1 %425 }
 0x4a0   :  { %4071 = vpow2.f32 %v2727_v62  ;;  %v2720_v2 = vsub.f32 %v2593_v33, %v2708_v63  ;;  %2752 = vadd.xlane.f32.xlu0 %v2751_v1  ;;  %v441_v7 = vcombine.low %v418_v48, %v426_v40  ;;  %v442_v9 = vcombine.high %v418_v48, %v426_v40 }
 0x4a2   :  { %v4529_v3 = vpop.eup %4067  ;;  %v2733_v4 = vmul.f32 1.442695, %v2720_v2  ;;  %v449_v24 = vrot.slane %v441_v7, %v4299_v28  ;;  %v456_v8 = vrot.slane %v442_v9, %v4299_v28 }
 0x4a3   :  { %v2742_v32 = vsel %vm2321_vm3, %v4529_v3, 0.0  ;;  %v430_v10 = vpop.permute.xlu1 %429 }
 0x4a4   :  { %4073 = vpow2.f32 %v2733_v4  ;;  %2743 = vadd.xlane.f32.xlu0 %v2742_v32 }
 0x4a6   :  { %v4533_v51 = vpop.eup %4069 }
 0x4a7   :  { %v2714_v52 = vpop.xlane.xlu0 %2713  ;;  %v2748_v5 = vsel %vm2321_vm3, %v4533_v51, 0.0 }
 0x4a8   :  { %2749 = vadd.xlane.f32.xlu1 %v2748_v5  ;;  %v2722_v2 = vsub.f32 %v4506_v38, %v2714_v52  ;;  %v420_v38 = vpop.permute.xlu1 %419 }
 0x4aa   :  { %v4537_v6 = vpop.eup %4071  ;;  %v2737_v4 = vmul.f32 1.442695, %v2722_v2 }
 0x4ab   :  { %v422_v11 = vpop.permute.xlu0 %421  ;;  %v2745_v19 = vsel %vm2321_vm3, %v4537_v6, 0.0 }
 0x4ac   :  { %v457_v20 = vcombine.low %v422_v11, %v430_v10  ;;  %v458_v21 = vcombine.high %v422_v11, %v430_v10  ;;  %2746 = vadd.xlane.f32.xlu0 %v2745_v19  ;;  %4075 = vpow2.f32 %v2737_v4 }
 0x4ae   :  { %v4541_v23 = vpop.eup %4073  ;;  %v465_v25 = vrot.slane %v457_v20, %v4299_v28  ;;  %v472_v26 = vrot.slane %v458_v21, %v4299_v28 }
 0x4af   :  { %v2754_v27 = vsel %vm2321_vm3, %v4541_v23, 0.0 }
 0x4b0   :  { %v473_v29 = vcombine.low %v449_v24, %v465_v25  ;;  %v474_v30 = vcombine.high %v449_v24, %v465_v25  ;;  %v489_v31 = vcombine.low %v456_v8, %v472_v26  ;;  %v490_v33 = vcombine.high %v456_v8, %v472_v26  ;;  %2755 = vadd.xlane.f32.xlu0 %v2754_v27 }
 0x4b2   :  { %v481_v34 = vrot.slane %v473_v29, %v4305_v41  ;;  %v488_v35 = vrot.slane %v474_v30, %v4305_v41  ;;  %v497_v36 = vrot.slane %v489_v31, %v4305_v41  ;;  %v504_v37 = vrot.slane %v490_v33, %v4305_v41 }
 0x4b4   :  { %v577_v39 = vcombine.low %v481_v34, %v488_v35  ;;  %v3804_v42 = vcombine.high %v481_v34, %v488_v35  ;;  %v593_v44 = vcombine.low %v497_v36, %v504_v37  ;;  %v3805_v43 = vcombine.high %v497_v36, %v504_v37 }
 0x4b6   :  { %v584_v45 = vrot.slane %v577_v39, %v4299_v28  ;;  %v592_v46 = vrot.slane %v3804_v42, %v4299_v28  ;;  %v600_v47 = vrot.slane %v593_v44, %v4299_v28  ;;  %v608_v48 = vrot.slane %v3805_v43, %v4299_v28  ;;  %v4574_v40 = vpop.eup %4075 }
 0x4b7   :  { %v2760_v5 = vsel %vm2321_vm3, %v4574_v40, 0.0 }
 0x4b8   :  { %v609_v50 = vcombine.low %v584_v45, %v592_v46  ;;  %v625_v15 = vcombine.low %v600_v47, %v608_v48  ;;  %v610_v53 = vcombine.high %v584_v45, %v592_v46  ;;  %v626_v14 = vcombine.high %v600_v47, %v608_v48 }
 0x4b9   :  { %427 = vrot.lane.b32.xlu1 %v4293_v17, %s4154_s27 }
 0x4ba   :  { %v617_v54 = vrot.slane %v609_v50, %v4305_v41  ;;  %v633_v12 = vrot.slane %v625_v15, %v4305_v41  ;;  %v624_v55 = vrot.slane %v610_v53, %v4305_v41  ;;  %v640_v56 = vrot.slane %v626_v14, %v4305_v41 }
 0x4bc   :  { %v641_v57 = vcombine.low %v617_v54, %v633_v12  ;;  %v642_v58 = vcombine.high %v617_v54, %v633_v12  ;;  %v643_v59 = vcombine.low %v624_v55, %v640_v56  ;;  %v644_v60 = vcombine.high %v624_v55, %v640_v56 }
 0x4bd   :  { %431 = vrot.lane.b32.xlu1 %v4295_v18, %s4154_s27  ;;  %v2721_v18 = vsub.f32 %v4498_v22, %v4522_v13 }
 0x4be   :  { %v2787_v62 = vpack.c.bf16 %v641_v57, %v641_v57  ;;  %v2788_v63 = vpack.c.bf16 %v642_v58, %v642_v58  ;;  %v2789_v9 = vpack.c.bf16 %v643_v59, %v643_v59  ;;  %v2790_v27 = vpack.c.bf16 %v644_v60, %v644_v60 }
 0x4bf   :  { %v2735_v32 = vmul.f32 1.442695, %v2721_v18 }
 0x4c0   :  { %v2799_v1 = vsel %vm2325_vm2, %v2787_v62, 0  ;;  %v2845_v17 = vsel %vm2325_vm2, %v2788_v63, 0  ;;  %v2891_v19 = vsel %vm2325_vm2, %v2789_v9, 0  ;;  %v2937_v36 = vsel %vm2325_vm2, %v2790_v27, 0 }
 0x4c1   :  { %3947 = vmatpush3.bf16.msra.mxu0 %v2799_v1  ;;  %3953 = vmatpush3.bf16.msra.mxu1 %v2845_v17  ;;  %4077 = vpow2.f32 %v2735_v32 }
 0x4c2   :  { %3958 = vmatprep.subr.bf16.mxu0 %v4156_v0  ;;  %3964 = vmatprep.subr.bf16.mxu1 %v4156_v0 }
 0x4c6   :  { %423 = vrot.lane.b32.xlu0 %v4289_v16, %s4154_s27  ;;  %s4164_s27 = smov 16  }
 0x4cb   :  { %v4578_v7 = vpop.eup %4077 }
 0x4cc   :  { %v2757_v16 = vsel %vm2321_vm3, %v4578_v7, 0.0 }
 0x4e1   :  { %2761 = vadd.xlane.f32.xlu1 %v2760_v5 }
 0x4e5   :  { %2758 = vadd.xlane.f32.xlu0 %v2757_v16 }
 0x51d   :  { %v2741_v52 = vpop.xlane.xlu1 %2740 }
 0x51e   :  { %4079 = vrcp.f32 %v2741_v52 }
 0x528   :  { %v4080_v22 = vpop.eup %4079 }
 0x529   :  { %v2771_v13 = vmul.f32 %v4080_v22, %v4518_v49 }
 0x52b   :  { %v2779_v10 = vpack.c.bf16 %v2771_v13, %v2771_v13 }
 0x52d   :  { %v2753_v11 = vpop.xlane.xlu0 %2752  ;;  %3949 = vmatmul.mubr.msk.bf16.vlgmr.msra.gmra.mrb[12].mxu0 %vm2321_vm3, %v2779_v10 }
 0x52e   :  { %3959 = vmatpush3.bf16.msra.mxu0 %v2891_v19  ;;  %3960 = vmatprep.mubr.msk.bf16.mxu0 %vm4157_vm0, %v4156_v0 }
 0x52f   :  { %3970 = vmatprep.subr.bf16.mxu0 %v4156_v0 }
 0x531   :  { %v2744_v20 = vpop.xlane.xlu0 %2743 }
 0x532   :  { %4081 = vrcp.f32 %v2744_v20 }
 0x535   :  { %v2750_v21 = vpop.xlane.xlu1 %2749 }
 0x536   :  { %4083 = vrcp.f32 %v2750_v21 }
 0x539   :  { %v2747_v24 = vpop.xlane.xlu0 %2746  ;;  %v428_v49 = vpop.permute.xlu1 %427 }
 0x53a   :  { %4085 = vrcp.f32 %v2747_v24  ;;  %v509_v31 = vcombine.low %v420_v38, %v428_v49  ;;  %v510_v33 = vcombine.high %v420_v38, %v428_v49 }
 0x53b   :  { %4087 = vrcp.f32 %v2753_v11 }
 0x53c   :  { %v4082_v8 = vpop.eup %4081  ;;  %v517_v44 = vrot.slane %v509_v31, %v4299_v28  ;;  %v524_v43 = vrot.slane %v510_v33, %v4299_v28 }
 0x53d   :  { %v2772_v25 = vmul.f32 %v4082_v8, %v4529_v3  ;;  %v2756_v26 = vpop.xlane.xlu0 %2755  ;;  %v432_v34 = vpop.permute.xlu1 %431 }
 0x53e   :  { %4089 = vrcp.f32 %v2756_v26 }
 0x53f   :  { %v2780_v29 = vpack.c.bf16 %v2772_v25, %v2772_v25 }
 0x540   :  { %v4084_v30 = vpop.eup %4083 }
 0x541   :  { %v424_v35 = vpop.permute.xlu0 %423  ;;  %3955 = vmatmul.mubr.msk.bf16.vlgmr.msra.gmra.mrb[24].mxu1 %vm2321_vm3, %v2780_v29  ;;  %v2774_v3 = vmul.f32 %v4084_v30, %v4533_v51 }
 0x542   :  { %v525_v37 = vcombine.low %v424_v35, %v432_v34  ;;  %v526_v39 = vcombine.high %v424_v35, %v432_v34  ;;  %3965 = vmatpush3.bf16.msra.mxu1 %v2937_v36  ;;  %3966 = vmatprep.mubr.msk.bf16.mxu1 %vm4157_vm0, %v4156_v0 }
 0x543   :  { %3976 = vmatprep.subr.bf16.mxu1 %v4156_v0  ;;  %v2782_v14 = vpack.c.bf16 %v2774_v3, %v2774_v3 }
 0x544   :  { %v4086_v42 = vpop.eup %4085  ;;  %v533_v45 = vrot.slane %v525_v37, %v4299_v28  ;;  %v540_v46 = vrot.slane %v526_v39, %v4299_v28 }
 0x545   :  { %v2773_v47 = vmul.f32 %v4086_v42, %v4537_v6  ;;  %v4088_v32 = vpop.eup %4087 }
 0x546   :  { %v541_v48 = vcombine.low %v517_v44, %v533_v45  ;;  %v542_v50 = vcombine.high %v517_v44, %v533_v45  ;;  %v557_v15 = vcombine.low %v524_v43, %v540_v46  ;;  %v558_v53 = vcombine.high %v524_v43, %v540_v46 }
 0x547   :  { %v2781_v51 = vpack.c.bf16 %v2773_v47, %v2773_v47  ;;  %v2775_v19 = vmul.f32 %v4088_v32, %v4525_v61 }
 0x548   :  { %v549_v54 = vrot.slane %v541_v48, %v4305_v41  ;;  %v556_v12 = vrot.slane %v542_v50, %v4305_v41  ;;  %v565_v55 = vrot.slane %v557_v15, %v4305_v41  ;;  %v572_v56 = vrot.slane %v558_v53, %v4305_v41  ;;  %v4090_v22 = vpop.eup %4089 }
 0x549   :  { %3961 = vmatmul.mubr.msk.bf16.vlgmr.msra.gmra.mrb[16].mxu0 %vm2321_vm3, %v2781_v51  ;;  %3967 = vmatmul.mubr.msk.bf16.vlgmr.msra.gmra.mrb[28].mxu1 %vm2321_vm3, %v2782_v14  ;;  %v2776_v20 = vmul.f32 %v4090_v22, %v4541_v23  ;;  %v2783_v27 = vpack.c.bf16 %v2775_v19, %v2775_v19 }
 0x54a   :  { %v645_v6 = vcombine.low %v549_v54, %v556_v12  ;;  %v3806_v57 = vcombine.high %v549_v54, %v556_v12  ;;  %v661_v58 = vcombine.low %v565_v55, %v572_v56  ;;  %v3807_v59 = vcombine.high %v565_v55, %v572_v56  ;;  %3972 = vmatprep.mubr.msk.bf16.mxu0 %vm4157_vm0, %v4156_v0 }
 0x54b   :  { %3978 = vmatprep.mubr.msk.bf16.mxu1 %vm4157_vm0, %v4156_v0  ;;  %v2784_v29 = vpack.c.bf16 %v2776_v20, %v2776_v20 }
 0x54c   :  { %v652_v60 = vrot.slane %v645_v6, %v4299_v28  ;;  %v660_v62 = vrot.slane %v3806_v57, %v4299_v28  ;;  %v668_v63 = vrot.slane %v661_v58, %v4299_v28  ;;  %v676_v1 = vrot.slane %v3807_v59, %v4299_v28 }
 0x54e   :  { %v677_v17 = vcombine.low %v652_v60, %v660_v62  ;;  %v693_v2 = vcombine.low %v668_v63, %v676_v1  ;;  %v678_v18 = vcombine.high %v652_v60, %v660_v62  ;;  %v694_v4 = vcombine.high %v668_v63, %v676_v1 }
 0x550   :  { %v685_v5 = vrot.slane %v677_v17, %v4305_v41  ;;  %v701_v16 = vrot.slane %v693_v2, %v4305_v41  ;;  %v692_v38 = vrot.slane %v678_v18, %v4305_v41  ;;  %v708_v52 = vrot.slane %v694_v4, %v4305_v41 }
 0x552   :  { %v709_v13 = vcombine.low %v685_v5, %v701_v16  ;;  %v710_v9 = vcombine.high %v685_v5, %v701_v16  ;;  %v711_v10 = vcombine.low %v692_v38, %v708_v52  ;;  %v712_v11 = vcombine.high %v692_v38, %v708_v52 }
 0x554   :  { %v2791_v21 = vpack.c.bf16 %v709_v13, %v709_v13  ;;  %v2792_v24 = vpack.c.bf16 %v710_v9, %v710_v9  ;;  %v2793_v25 = vpack.c.bf16 %v711_v10, %v711_v10  ;;  %v2794_v26 = vpack.c.bf16 %v712_v11, %v712_v11 }
 0x556   :  { %v2983_v49 = vsel %vm2325_vm2, %v2791_v21, 0  ;;  %v3029_v8 = vsel %vm2325_vm2, %v2792_v24, 0  ;;  %v3075_v61 = vsel %vm2325_vm2, %v2793_v25, 0  ;;  %v3121_v23 = vsel %vm2325_vm2, %v2794_v26, 0 }
 0x557   :  { %3971 = vmatpush3.bf16.msra.mxu0 %v2983_v49  ;;  %3977 = vmatpush3.bf16.msra.mxu1 %v3029_v8 }
 0x558   :  { %3982 = vmatprep.subr.bf16.mxu0 %v4156_v0  ;;  %3988 = vmatprep.subr.bf16.mxu1 %v4156_v0 }
 0x55a   :  { %3973 = vmatmul.mubr.msk.bf16.vlgmr.msra.gmra.mrb[20].mxu0 %vm2321_vm3, %v2783_v27  ;;  %3979 = vmatmul.mubr.msk.bf16.vlgmr.msra.gmra.mrb[32].mxu1 %vm2321_vm3, %v2784_v29 }
 0x55b   :  { %3983 = vmatpush3.bf16.msra.mxu0 %v3075_v61  ;;  %3989 = vmatpush3.bf16.msra.mxu1 %v3121_v23 }
 0x55c   :  { %3990 = vmatprep.mubr.msk.bf16.mxu1 %vm4157_vm0, %v4156_v0  ;;  %3984 = vmatprep.mubr.msk.bf16.mxu0 %vm4157_vm0, %v4156_v0 }
 0x55d   :  { %3994 = vmatprep.subr.bf16.mxu0 %v4156_v0  ;;  %4002 = vmatprep.subr.bf16.mxu1 %v4156_v0 }
 0x56e   :  { %v2762_v30 = vpop.xlane.xlu1 %2761 }
 0x56f   :  { %4091 = vrcp.f32 %v2762_v30 }
 0x572   :  { %v2759_v31 = vpop.xlane.xlu0 %2758 }
 0x573   :  { %4093 = vrcp.f32 %v2759_v31 }
 0x579   :  { %v4092_v33 = vpop.eup %4091 }
 0x57a   :  { %v2778_v34 = vmul.f32 %v4092_v33, %v4574_v40 }
 0x57c   :  { %v2786_v35 = vpack.c.bf16 %v2778_v34, %v2778_v34 }
 0x57d   :  { %v4094_v36 = vpop.eup %4093 }
 0x57e   :  { %v2777_v37 = vmul.f32 %v4094_v36, %v4578_v7  ;;  %3991 = vmatmul.mubr.msk.bf16.vlgmr.msra.gmra.mrb[36].mxu1 %vm2321_vm3, %v2786_v35 }
 0x57f   :  { %4006 = vmatprep.mubr.msk.bf16.mxu1 %vm4157_vm0, %v4156_v0 }
 0x580   :  { %v2785_v39 = vpack.c.bf16 %v2777_v37, %v2777_v37 }
 0x582   :  { %3985 = vmatmul.mubr.msk.bf16.vlgmr.msra.gmra.mrb[24].mxu0 %vm2321_vm3, %v2785_v39 }
 0x583   :  { %3998 = vmatprep.mubr.msk.bf16.mxu0 %vm4157_vm0, %v4156_v0 }
 0x600   :  { %v2835_v3 = vpop.f32.mrb[12].mxu0 }
 0x601   :  { %v3950_v42 = vpop.f32.mrb[13].mxu0 }
 0x602   :  { %v2838_v44 = vpop.f32.mrb[14].mxu0 }
 0x603   :  { %v3951_v43 = vpop.f32.mrb[15].mxu0 }
 0x614   :  { %v2881_v40 = vpop.f32.mrb[24].mxu1 }
 0x615   :  { %v3956_v45 = vpop.f32.mrb[25].mxu1 }
 0x616   :  { %v2884_v46 = vpop.f32.mrb[26].mxu1 }
 0x617   :  { %v3957_v47 = vpop.f32.mrb[27].mxu1 }
 0x61c   :  { %v2927_v7 = vpop.f32.mrb[16].mxu0  ;;  %v2973_v48 = vpop.f32.mrb[28].mxu1 }
 0x61d   :  { %v3163_v50 = vcombine.low %v2835_v3, %v2927_v7  ;;  %v3164_v15 = vcombine.high %v2835_v3, %v2927_v7  ;;  %v3179_v53 = vcombine.low %v2881_v40, %v2973_v48  ;;  %v3180_v51 = vcombine.high %v2881_v40, %v2973_v48  ;;  %v3962_v14 = vpop.f32.mrb[17].mxu0  ;;  %v3968_v54 = vpop.f32.mrb[29].mxu1 }
 0x61e   :  { %v2930_v12 = vpop.f32.mrb[18].mxu0  ;;  %v2976_v55 = vpop.f32.mrb[30].mxu1 }
 0x61f   :  { %v3171_v56 = vrot.slane %v3163_v50, %v4299_v28  ;;  %v3178_v6 = vrot.slane %v3164_v15, %v4299_v28  ;;  %v3187_v57 = vrot.slane %v3179_v53, %v4299_v28  ;;  %v3194_v58 = vrot.slane %v3180_v51, %v4299_v28  ;;  %v3963_v59 = vpop.f32.mrb[19].mxu0  ;;  %v3969_v60 = vpop.f32.mrb[31].mxu1 }
 0x621   :  { %v3195_v62 = vcombine.low %v3171_v56, %v3187_v57  ;;  %v3196_v63 = vcombine.high %v3171_v56, %v3187_v57  ;;  %v3211_v1 = vcombine.low %v3178_v6, %v3194_v58  ;;  %v3212_v17 = vcombine.high %v3178_v6, %v3194_v58 }
 0x623   :  { %v3203_v2 = vrot.slane %v3195_v62, %v4305_v41  ;;  %v3210_v18 = vrot.slane %v3196_v63, %v4305_v41  ;;  %v3219_v4 = vrot.slane %v3211_v1, %v4305_v41  ;;  %v3226_v32 = vrot.slane %v3212_v17, %v4305_v41  ;;  %v4055_v17 = vld [vmem:[%s4783_s3] sm:$0xff]  }
 0x624   :  { %3995 = vmatpush3.bf16.msra.mxu0 %v4055_v17 }
 0x625   :  { %v3299_v5 = vcombine.low %v3203_v2, %v3210_v18  ;;  %v3824_v16 = vcombine.high %v3203_v2, %v3210_v18  ;;  %v3315_v38 = vcombine.low %v3219_v4, %v3226_v32  ;;  %v3825_v52 = vcombine.high %v3219_v4, %v3226_v32  ;;  %3996 = vmatprep.subr.bf16.mxu0 %v4156_v0 }
 0x627   :  { %v3306_v22 = vrot.slane %v3299_v5, %v4299_v28  ;;  %v3314_v13 = vrot.slane %v3824_v16, %v4299_v28  ;;  %v3322_v9 = vrot.slane %v3315_v38, %v4299_v28  ;;  %v3330_v10 = vrot.slane %v3825_v52, %v4299_v28 }
 0x629   :  { %v3332_v11 = vcombine.high %v3306_v22, %v3314_v13  ;;  %v3348_v19 = vcombine.high %v3322_v9, %v3330_v10  ;;  %v3331_v20 = vcombine.low %v3306_v22, %v3314_v13  ;;  %v3347_v21 = vcombine.low %v3322_v9, %v3330_v10 }
 0x62b   :  { %v4655_v24 = vrot.slane %v3332_v11, %v4305_v41  ;;  %v4658_v49 = vrot.slane %v3348_v19, %v4305_v41  ;;  %v4661_v8 = vrot.slane %v3331_v20, %v4305_v41  ;;  %v4664_v25 = vrot.slane %v3347_v21, %v4305_v41  ;;  %v4056_v11 = vld [vmem:[%s4783_s3 + $0x8] sm:$0xff]  }
 0x62c   :  { %3997 = vmatpush3.bf16.msra.mxu0 %v4056_v11 }
 0x62d   :  { %v3019_v26 = vpop.f32.mrb[20].mxu0  ;;  %v3065_v27 = vpop.f32.mrb[32].mxu1  ;;  %v3365_v29 = vcombine.low %v4655_v24, %v4658_v49  ;;  %v3363_v61 = vcombine.low %v4661_v8, %v4664_v25  ;;  %v3364_v23 = vcombine.high %v4661_v8, %v4664_v25  ;;  %v3366_v30 = vcombine.high %v4655_v24, %v4658_v49  ;;  %4010 = vmatprep.subr.bf16.mxu0 %v4156_v0  ;;  %v3828_v8 = vld [vmem:[%s4784_s4] ss:$0 sm:$0xff] }
 0x62e   :  { %v3974_v31 = vpop.f32.mrb[21].mxu0  ;;  %v3980_v33 = vpop.f32.mrb[33].mxu1 }
 0x62f   :  { %v3022_v34 = vpop.f32.mrb[22].mxu0  ;;  %v3068_v35 = vpop.f32.mrb[34].mxu1 }
 0x630   :  { %v3975_v36 = vpop.f32.mrb[23].mxu0  ;;  %v3981_v37 = vpop.f32.mrb[35].mxu1 }
 0x651   :  { %v3157_v39 = vpop.f32.mrb[36].mxu1 }
 0x652   :  { %v3247_v3 = vcombine.low %v3065_v27, %v3157_v39  ;;  %v3248_v42 = vcombine.high %v3065_v27, %v3157_v39  ;;  %v3992_v44 = vpop.f32.mrb[37].mxu1 }
 0x653   :  { %v3160_v43 = vpop.f32.mrb[38].mxu1 }
 0x654   :  { %v3993_v40 = vpop.f32.mrb[39].mxu1  ;;  %v3255_v50 = vrot.slane %v3247_v3, %v4299_v28  ;;  %v3262_v15 = vrot.slane %v3248_v42, %v4299_v28 }
 0x655   :  { %v3111_v45 = vpop.f32.mrb[24].mxu0 }
 0x656   :  { %v3231_v46 = vcombine.low %v3019_v26, %v3111_v45  ;;  %v3232_v47 = vcombine.high %v3019_v26, %v3111_v45  ;;  %v3986_v7 = vpop.f32.mrb[25].mxu0 }
 0x657   :  { %v3114_v48 = vpop.f32.mrb[26].mxu0 }
 0x658   :  { %v3239_v53 = vrot.slane %v3231_v46, %v4299_v28  ;;  %v3246_v51 = vrot.slane %v3232_v47, %v4299_v28  ;;  %v3987_v14 = vpop.f32.mrb[27].mxu0  ;;  %v4103_v46 = vld [vmem:[%s4780_s0] sm:$0xff] }
 0x65a   :  { %v3263_v54 = vcombine.low %v3239_v53, %v3255_v50  ;;  %v3264_v12 = vcombine.high %v3239_v53, %v3255_v50  ;;  %v3279_v55 = vcombine.low %v3246_v51, %v3262_v15  ;;  %v3280_v56 = vcombine.high %v3246_v51, %v3262_v15  ;;  %v4104_v50 = vld [vmem:[%s4780_s0 + $0x8] sm:$0xff] }
 0x65c   :  { %v3271_v6 = vrot.slane %v3263_v54, %v4305_v41  ;;  %v3278_v57 = vrot.slane %v3264_v12, %v4305_v41  ;;  %v3287_v58 = vrot.slane %v3279_v55, %v4305_v41  ;;  %v3294_v59 = vrot.slane %v3280_v56, %v4305_v41  ;;  %v4057_v56 = vld [vmem:[#allocation2] sm:$0xff]  }
 0x65d   :  { %4003 = vmatpush3.bf16.msra.mxu1 %v4057_v56 }
 0x65e   :  { %v3367_v60 = vcombine.low %v3271_v6, %v3278_v57  ;;  %v3826_v62 = vcombine.high %v3271_v6, %v3278_v57  ;;  %v3383_v63 = vcombine.low %v3287_v58, %v3294_v59  ;;  %v3827_v1 = vcombine.high %v3287_v58, %v3294_v59  ;;  %v4058_v6 = vld [vmem:[#allocation2 + $0x8] sm:$0xff]   ;;  %4004 = vmatprep.subr.bf16.mxu1 %v4156_v0  ;;  %v4059_v57 = vld [vmem:[%s4787_s7] sm:$0xff]  }
 0x65f   :  { %v4060_v58 = vld [vmem:[%s4787_s7 + $0x8] sm:$0xff]  }
 0x660   :  { %v3374_v2 = vrot.slane %v3367_v60, %v4299_v28  ;;  %v3382_v18 = vrot.slane %v3826_v62, %v4299_v28  ;;  %v3390_v4 = vrot.slane %v3383_v63, %v4299_v28  ;;  %v3398_v32 = vrot.slane %v3827_v1, %v4299_v28 }
 0x661   :  { %4005 = vmatpush3.bf16.msra.mxu1 %v4058_v6 }
 0x662   :  { %v3400_v5 = vcombine.high %v3374_v2, %v3382_v18  ;;  %v3416_v16 = vcombine.high %v3390_v4, %v3398_v32  ;;  %v3399_v38 = vcombine.low %v3374_v2, %v3382_v18  ;;  %v3415_v52 = vcombine.low %v3390_v4, %v3398_v32 }
 0x664   :  { %v3414_v22 = vrot.slane %v3400_v5, %v4305_v41  ;;  %v3430_v13 = vrot.slane %v3416_v16, %v4305_v41  ;;  %v3407_v9 = vrot.slane %v3399_v38, %v4305_v41  ;;  %v3423_v10 = vrot.slane %v3415_v52, %v4305_v41 }
 0x666   :  { %v3433_v28 = vcombine.low %v3414_v22, %v3430_v13  ;;  %v3432_v19 = vcombine.high %v3407_v9, %v3423_v10  ;;  %v3431_v20 = vcombine.low %v3407_v9, %v3423_v10  ;;  %v3434_v21 = vcombine.high %v3414_v22, %v3430_v13  ;;  %v4732_v9 = vld [vmem:[%s4789_s9] ss:$0 sm:$0xff] }
 0x668   :  { %v4043_v24 = vpack.i.bf16 %v3433_v28, %v3365_v29  ;;  %v4038_v49 = vpack.i.bf16 %v3432_v19, %v3364_v23  ;;  %v4048_v26 = vpack.i.bf16 %v3434_v21, %v3366_v30  ;;  %v4738_v21 = vld [vmem:[%s4790_s10] ss:$0 sm:$0xff] }
 0x66a   :  { %4044 = vrot.lane.b32.xlu1 %v4043_v24, %s4164_s27  ;;  %4039 = vrot.lane.b32.xlu0 %v4038_v49, %s4165_s28 }
 0x66e   :  { %4049 = vrot.lane.b32.xlu0 %v4048_v26, %s4166_s29 }
 0x6dc   :  { %v4045_v41 = vpop.permute.xlu1 %4044  ;;  %v4040_v27 = vpop.permute.xlu0 %4039 }
 0x6dd   :  { %v4042_v31 = vunpack.i.h.bf16 %v4040_v27  ;;  %v4041_v33 = vunpack.i.l.bf16 %v4040_v27  ;;  %v4047_v34 = vunpack.i.h.bf16 %v4045_v41  ;;  %v4046_v35 = vunpack.i.l.bf16 %v4045_v41  ;;  %v4061_v27 = vld [vmem:[%s4787_s7 + $0x10] sm:$0xff]  }
 0x6df   :  { %v3459_v29 = vsel %vm2321_vm3, %v3363_v61, %v4041_v33  ;;  %v3460_v23 = vsel %vm2321_vm3, %v3431_v20, %v4042_v31  ;;  %v4062_v31 = vld [vmem:[%s4787_s7 + $0x18] sm:$0xff]   ;;  %v3834_v33 = vld [vmem:[%s4786_s6] ss:$0 sm:$0xff]  ;;  %s4167_s6 = smov [#allocation5]  }
 0x6e0   :  { %v4050_v30 = vpop.permute.xlu0 %4049  ;;  %v3462_v39 = vsel %vm3461_vm4, %v3459_v29, %v4046_v35  ;;  %v3463_v3 = vsel %vm3461_vm4, %v3460_v23, %v4047_v34  ;;  %s3784_s7 = sshll.u32 %s4167_s6, 4  ;;  %s3785_s7 = int_to_ptr.vmem [resolvable:$true] %s3784_s7 }
 0x6e1   :  { %v4052_v36 = vunpack.i.h.bf16 %v4050_v30  ;;  %v4051_v37 = vunpack.i.l.bf16 %v4050_v30  ;;  %p4132_p9 = scmp.lt.s32.totalorder %s3785_s7, %s3785_s7 }
 0x6e3   :  { %v3465_v42 = vsel %vm3464_vm5, %v3462_v39, %v4051_v37  ;;  %v3466_v44 = vsel %vm3464_vm5, %v3463_v3, %v4052_v36 }
 0x6e4   :  { %v3467_v43 = vpack.c.bf16 %v3466_v44, %v3465_v42 }
 0x6e6   :  { %3999 = vmatmul.mubr.msk.bf16.vlgmr.msra.gmra.mrb[28].mxu0 %vm80_vm1, %v3467_v43 }
 0x6e7   :  { %4018 = vmatprep.mubr.msk.bf16.mxu0 %vm4157_vm0, %v4156_v0  ;;  %4011 = vmatpush3.bf16.msra.mxu0 %v4059_v57 }
 0x6e8   :  { %4012 = vmatprep.subr.bf16.mxu0 %v4156_v0 }
 0x6eb   :  { %4013 = vmatpush3.bf16.msra.mxu0 %v4060_v58 }
 0x6ec   :  { %4014 = vmatprep.subr.bf16.mxu0 %v4156_v0 }
 0x6ef   :  { %4015 = vmatpush3.bf16.msra.mxu0 %v4061_v27 }
 0x6f0   :  { %4016 = vmatprep.subr.bf16.mxu0 %v4156_v0  ;;  %v3838_v0 = vld [vmem:[%s4788_s8] ss:$0 sm:$0xff]  ;;  %s4127_s8 = scalar_lea.vmem %s3785_s7, 256 }
 0x6f1   :  { %p4128_p8 = scmp.ne.s32.totalorder %s3785_s7, %s4127_s8  ;;  %p4133_p10 = scmp.lt.s32.totalorder %s4127_s8, %s4127_s8 }
 0x6f3   :  { %4017 = vmatpush3.bf16.msra.mxu0 %v4062_v31  ;;  %p4134_p11 = por %p4133_p10, %p4132_p9 }
 0x6f5   :  { %p4135_p12 = pnand %p4134_p11, %p4128_p8 }
 0x7b9   :  { %v3528_v25 = vpop.f32.mrb[28].mxu0 }
 0x7ba   :  { %v3529_v61 = vadd.f32 %v3828_v8, %v3528_v25  ;;  %v4000_v40 = vpop.f32.mrb[29].mxu0 }
 0x7bb   :  { %v3531_v45 = vpop.f32.mrb[30].mxu0 }
 0x7bc   :  { %v3537_v47 = vadd.f32 %v4103_v46, %v3529_v61  ;;  %v3532_v7 = vadd.f32 %v3828_v8, %v3531_v45  ;;  %v4001_v48 = vpop.f32.mrb[31].mxu0 }
 0x7be   :  { %v3538_v15 = vadd.f32 %v4104_v50, %v3532_v7  ;;  %v3539_v53 = vsel %vm80_vm1, %v3537_v47, 0.0  ;;  %v3548_v54 = vmul.f32 %v3537_v47, %v3537_v47 }
 0x7bf   :  { %3540 = vadd.xlane.f32.xlu1 %v3539_v53 }
 0x7c0   :  { %v3542_v51 = vsel %vm80_vm1, %v3538_v15, 0.0  ;;  %v3549_v14 = vmul.f32 %v3538_v15, %v3538_v15  ;;  %v3550_v55 = vsel %vm80_vm1, %v3548_v54, 0.0 }
 0x7c1   :  { %3543 = vadd.xlane.f32.xlu0 %v3542_v51 }
 0x7c2   :  { %v3553_v12 = vsel %vm80_vm1, %v3549_v14, 0.0 }
 0x7c3   :  { %3554 = vadd.xlane.f32.xlu1 %v3553_v12 }
 0x7c5   :  { %3551 = vadd.xlane.f32.xlu0 %v3550_v55 }
 0x84c   :  { %v3541_v59 = vpop.xlane.xlu1 %3540 }
 0x84d   :  { %v3546_v62 = vmul.f32 0.03125, %v3541_v59 }
 0x84e   :  { %v3544_v60 = vpop.xlane.xlu0 %3543 }
 0x84f   :  { %v3547_v63 = vmul.f32 0.03125, %v3544_v60  ;;  %v3558_v4 = vmul.f32 %v3546_v62, %v3546_v62  ;;  %v3562_v10 = vsub.f32 %v3537_v47, %v3546_v62 }
 0x850   :  { %v3555_v1 = vpop.xlane.xlu1 %3554 }
 0x851   :  { %v3559_v17 = vmul.f32 %v3547_v63, %v3547_v63  ;;  %v3557_v2 = vmul.f32 0.03125, %v3555_v1  ;;  %v3563_v22 = vsub.f32 %v3538_v15, %v3547_v63 }
 0x852   :  { %v3552_v18 = vpop.xlane.xlu0 %3551 }
 0x853   :  { %v3561_v32 = vsub.f32 %v3557_v2, %v3559_v17  ;;  %v3556_v5 = vmul.f32 0.03125, %v3552_v18 }
 0x855   :  { %v3565_v16 = vadd.f32 1e-05, %v3561_v32  ;;  %v3560_v38 = vsub.f32 %v3556_v5, %v3558_v4 }
 0x857   :  { %4095 = vrsqrt.f32 %v3565_v16  ;;  %v3564_v52 = vadd.f32 1e-05, %v3560_v38 }
 0x859   :  { %4097 = vrsqrt.f32 %v3564_v52 }
 0x861   :  { %v4096_v13 = vpop.eup %4095 }
 0x862   :  { %v3569_v11 = vmul.f32 %v4096_v13, %v3563_v22 }
 0x863   :  { %v4098_v28 = vpop.eup %4097 }
 0x864   :  { %v3568_v19 = vmul.f32 %v4098_v28, %v3562_v10  ;;  %v3577_v20 = vmul.f32 %v4732_v9, %v3569_v11 }
 0x866   :  { %v3576_v24 = vmul.f32 %v4732_v9, %v3568_v19  ;;  %v3585_v26 = vadd.f32 %v4738_v21, %v3577_v20 }
 0x868   :  { %v3584_v49 = vadd.f32 %v4738_v21, %v3576_v24 }
 0x86a   :  { %v3586_v41 = vpack.c.bf16 %v3585_v26, %v3584_v49 }
 0x86c   :  { %4007 = vmatmul.mubr.msk.bf16.vlgmr.msra.gmra.mrb[40].mxu1 %vm80_vm1, %v3586_v41 }
 0x93f   :  { %v3647_v34 = vpop.f32.mrb[40].mxu1 }
 0x940   :  { %v3648_v35 = vadd.f32 %v3834_v33, %v3647_v34  ;;  %v4008_v29 = vpop.f32.mrb[41].mxu1 }
 0x941   :  { %v3650_v23 = vpop.f32.mrb[42].mxu1 }
 0x942   :  { %v3651_v30 = vadd.f32 %v3834_v33, %v3650_v23  ;;  %v4009_v36 = vpop.f32.mrb[43].mxu1  ;;  %v3654_v37 = vmax.f32 %v3648_v35, 0.0 }
 0x944   :  { %v3655_v39 = vmax.f32 %v3651_v30, 0.0 }
 0x946   :  { %v3656_v3 = vpack.c.bf16 %v3655_v39, %v3654_v37 }
 0x948   :  { %4019 = vmatmul.mubr.msk.bf16.vlgmr.msra.gmra.mrb[32].mxu0 %vm3696_vm6, %v3656_v3 }
 0xa1b   :  { %v3734_v42 = vpop.f32.mrb[32].mxu0 }
 0xa1c   :  { %v3735_v44 = vadd.f32 %v3838_v0, %v3734_v42  ;;  %v4020_v43 = vpop.f32.mrb[33].mxu0 }
 0xa1d   :  { %v3737_v8 = vpop.f32.mrb[34].mxu0 }
 0xa1e   :  { %v3741_v25 = vadd.f32 %v3735_v44, %v3584_v49  ;;  %v3738_v61 = vadd.f32 %v3838_v0, %v3737_v8  ;;  %v4021_v40 = vpop.f32.mrb[35].mxu0 }
 0xa20   :  { %v3742_v45 = vadd.f32 %v3738_v61, %v3585_v26  ;;  %v3743_v46 = vsel %vm80_vm1, %v3741_v25, 0.0  ;;  %v3751_v47 = vmul.f32 %v3741_v25, %v3741_v25 }
 0xa21   :  { %3744 = vadd.xlane.f32.xlu0 %v3743_v46 }
 0xa22   :  { %v3746_v7 = vsel %vm80_vm1, %v3742_v45, 0.0  ;;  %v3752_v48 = vmul.f32 %v3742_v45, %v3742_v45  ;;  %v3753_v50 = vsel %vm80_vm1, %v3751_v47, 0.0 }
 0xa23   :  { %3747 = vadd.xlane.f32.xlu1 %v3746_v7 }
 0xa24   :  { %v3756_v15 = vsel %vm80_vm1, %v3752_v48, 0.0 }
 0xa25   :  { %3754 = vadd.xlane.f32.xlu0 %v3753_v50 }
 0xa27   :  { %3757 = vadd.xlane.f32.xlu1 %v3756_v15 }
 0xaae   :  { %v3745_v53 = vpop.xlane.xlu0 %3744 }
 0xaaf   :  { %v3749_v51 = vmul.f32 0.03125, %v3745_v53 }
 0xab0   :  { %v3748_v14 = vpop.xlane.xlu1 %3747 }
 0xab1   :  { %v3750_v54 = vmul.f32 0.03125, %v3748_v14  ;;  %v3761_v55 = vmul.f32 %v3749_v51, %v3749_v51  ;;  %v3765_v1 = vsub.f32 %v3741_v25, %v3749_v51 }
 0xab2   :  { %v3755_v12 = vpop.xlane.xlu0 %3754 }
 0xab3   :  { %v3759_v56 = vmul.f32 0.03125, %v3755_v12  ;;  %v3762_v57 = vmul.f32 %v3750_v54, %v3750_v54  ;;  %v3766_v2 = vsub.f32 %v3742_v45, %v3750_v54 }
 0xab4   :  { %v3758_v6 = vpop.xlane.xlu1 %3757 }
 0xab5   :  { %v3763_v58 = vsub.f32 %v3759_v56, %v3761_v55  ;;  %v3760_v59 = vmul.f32 0.03125, %v3758_v6 }
 0xab7   :  { %v3767_v60 = vadd.f32 1e-05, %v3763_v58  ;;  %v3764_v62 = vsub.f32 %v3760_v59, %v3762_v57 }
 0xab9   :  { %4099 = vrsqrt.f32 %v3767_v60  ;;  %v3768_v63 = vadd.f32 1e-05, %v3764_v62 }
 0xabb   :  { %4101 = vrsqrt.f32 %v3768_v63 }
 0xac3   :  { %v4100_v17 = vpop.eup %4099 }
 0xac4   :  { %v3771_v18 = vmul.f32 %v4100_v17, %v3765_v1 }
 0xac5   :  { %v4102_v4 = vpop.eup %4101 }
 0xac6   :  { %v3772_v32 = vmul.f32 %v4102_v4, %v3766_v2  ;;  %v3773_v5 = vmul.f32 %v4732_v9, %v3771_v18 }
 0xac8   :  { %v3774_v16 = vmul.f32 %v4732_v9, %v3772_v32  ;;  %v3775_v38 = vadd.f32 %v4738_v21, %v3773_v5 }
 0xaca   :  { %v3776_v52 = vadd.f32 %v4738_v21, %v3774_v16  ;;  %3777 = vst.msk [vmem:[#allocation5] sm:$0xff] %vm80_vm1, %v3775_v38 }
 0xacc   :  { %3778 = vst.msk [vmem:[#allocation5 + $0x8] sm:$0xff] %vm80_vm1, %v3776_v52 }
 0xacd   :  { %4138 = shalt.err (!%p4135_p12)
}
 0xace   :  { %s4139_s27 = scalar_lea.hbm %s4791_s11, 256 }
 0xacf   :  { %p4140_p13 = scmp.ne.s32.totalorder %s4791_s11, %s4139_s27  ;;  %p4143_p0 = scmp.lt.u32.totalorder %s4139_s27, %s4791_s11 }
 0xad1   :  { %p4145_p1 = pnand %p4143_p0, %p4140_p13 }
 0xad3   :  { %4148 = shalt.err (!%p4145_p1)
}
 0xad4   :  { %s4168_s13 = smov 128  }
 0xad5   :  { %3790 = dma.vmem_to_hbm [thread:$0]  %s3785_s7, 256, %s4791_s11, [#allocation4], %s4168_s13, %s4168_s13, %s4165_s28  }
 0xad6   :  { %4151 = dma.done.wait [#allocation4], 256  }
 0xad7   :  { %4152 = vsyncadd [#allocation4], 4294967040 }
 0xad8   :  { %3794 = vsyncpa [#allocation3], 1 }
 0xad9   :  { %3795 = vsyncpa [#allocation4], 1 }

</bundles_post_ra>
